<compile_context>
chip_gen: v7x
topology: tpu7x:2x2x1
jax: 0.10.0
libtpu: 0.0.40
codegen_flags: <defaults>
</compile_context>

<pallas_src>
import functools

import jax
import jax.numpy as jnp
from jax.experimental import pallas as pl
from jax.experimental.pallas import tpu as pltpu


# ----------------------------------------------------------------------------
# Fused CarnBlock kernel (one image per grid step, activations as (C, HW))
# ----------------------------------------------------------------------------
def _carn_block_kernel(x_ref, m_ref, w33_ref, b33_ref, wcc_ref, bcc_ref, o_ref,
                       *, W):
    C = x_ref.shape[1]
    HW = x_ref.shape[2]

    # Border-validity masks (0/1 f32) for the 9 taps, loaded once. (1, HW) each.
    masks = [m_ref[t] for t in range(9)]

    def conv3x3(x_flat, idx):
        """3x3 conv (stride 1, pad 1) + bias, transposed: (C, HW) -> (C, HW)."""
        acc = None
        t = 0
        for dy in (-1, 0, 1):
            for dx in (-1, 0, 1):
                off = dy * W + dx
                if off == 0:
                    sh = x_flat                       # center tap: no shift/mask
                else:
                    # shifted[hw] = x[hw + off]  (wrapped values zeroed by mask)
                    sh = pltpu.roll(x_flat, (-off) % HW, 1) * masks[t]
                d = jnp.dot(w33_ref[idx, t], sh,
                            preferred_element_type=jnp.float32)
                acc = d if acc is None else acc + d
                t += 1
        return acc + b33_ref[idx]                      # (C, 1) bias broadcasts

    def residual_block(x_flat, k):
        h = jnp.maximum(conv3x3(x_flat, 2 * k), 0.0)
        return jnp.maximum(conv3x3(h, 2 * k + 1) + x_flat, 0.0)

    x = x_ref[0]                                       # (C, HW), lane-dense

    # Cascade.  c_k = concat([x, b1, ..., b_k], channel) is never materialized:
    # the 1x1 conv over c_k is the sum of per-source (C,C)x(C,HW) matmuls
    # against consecutive chunks of the packed (transposed) 1x1 weight wcc.
    feats = [x]
    o_prev = x
    col = 0
    for k in range(3):
        feats.append(residual_block(o_prev, k))
        acc = bcc_ref[k]                               # (C, 1), broadcasts
        for f in feats:
            acc = acc + jnp.dot(wcc_ref[col], f,
                                preferred_element_type=jnp.float32)
            col += 1
        o_prev = jnp.maximum(acc, 0.0)                 # o_k

    o_ref[0] = o_prev.astype(o_ref.dtype)


def _carn_block_fused(x2, masks, w33, b33, wcc, bcc, W):
    N, C, HW = x2.shape
    kernel = functools.partial(_carn_block_kernel, W=W)
    return pl.pallas_call(
        kernel,
        out_shape=jax.ShapeDtypeStruct((N, C, HW), jnp.float32),
        grid=(N,),
        in_specs=[
            pl.BlockSpec((1, C, HW), lambda n: (n, 0, 0)),
            pl.BlockSpec(masks.shape, lambda n: (0, 0, 0)),
            pl.BlockSpec(w33.shape, lambda n: (0, 0, 0, 0)),
            pl.BlockSpec(b33.shape, lambda n: (0, 0, 0)),
            pl.BlockSpec(wcc.shape, lambda n: (0, 0, 0)),
            pl.BlockSpec(bcc.shape, lambda n: (0, 0, 0)),
        ],
        out_specs=pl.BlockSpec((1, C, HW), lambda n: (n, 0, 0)),
        compiler_params=pltpu.CompilerParams(
            dimension_semantics=("parallel",)),
    )(x2, masks, w33, b33, wcc, bcc)


# ----------------------------------------------------------------------------
# One-time parameter packing (HWIO conv weights -> transposed, matmul-ready)
# Call this OUTSIDE the jitted forward (at parameter-load time).
# ----------------------------------------------------------------------------
def pack_params(p):
    C = p["b1"][1].shape[0]

    def w3_t(w):                 # (3,3,Cin,Cout) -> (9, Cout, Cin), tap = ky*3+kx
        return jnp.transpose(w, (0, 1, 3, 2)).reshape(9, C, C)

    def w1_t(w, n):              # (1,1,n*C,Cout) -> (n, Cout, C), split per source
        return jnp.transpose(w[0, 0].reshape(n, C, C), (0, 2, 1))

    w33 = jnp.stack([w3_t(p["b1"][0]), w3_t(p["b1"][2]),
                     w3_t(p["b2"][0]), w3_t(p["b2"][2]),
                     w3_t(p["b3"][0]), w3_t(p["b3"][2])])          # (6, 9, C, C)
    b33 = jnp.stack([p["b1"][1], p["b1"][3], p["b2"][1], p["b2"][3],
                     p["b3"][1], p["b3"][3]]).reshape(6, C, 1)
    wcc = jnp.concatenate([w1_t(p["c1"][0], 2),
                           w1_t(p["c2"][0], 3),
                           w1_t(p["c3"][0], 4)], axis=0)            # (9, C, C)
    bcc = jnp.stack([p["c1"][1], p["c2"][1], p["c3"][1]]).reshape(3, C, 1)
    return w33, b33, wcc, bcc


def _make_tap_masks(H, W):
    """(9, 1, H*W) f32 0/1 masks; tap t=(dy+1)*3+(dx+1) valid iff pixel+dy,dx in-bounds."""
    idx = jnp.arange(H * W, dtype=jnp.int32)
    h, w = idx // W, idx % W
    masks = []
    for dy in (-1, 0, 1):
        for dx in (-1, 0, 1):
            ok = ((h + dy >= 0) & (h + dy <= H - 1) &
                  (w + dx >= 0) & (w + dx <= W - 1))
            masks.append(ok)
    return jnp.stack(masks).astype(jnp.float32).reshape(9, 1, H * W)


# ----------------------------------------------------------------------------
# CarnBlock forward: NCHW in, NCHW out, no transposes (only free HBM reshapes)
# ----------------------------------------------------------------------------
@jax.jit
def carn_forward(x_nchw, packed):
    w33, b33, wcc, bcc = packed
    N, C, H, W = x_nchw.shape
    x2 = x_nchw.astype(jnp.float32).reshape(N, C, H * W)
    masks = _make_tap_masks(H, W)          # constant-folded by XLA
    y2 = _carn_block_fused(x2, masks, w33, b33, wcc, bcc, W)
    return y2.reshape(N, C, H, W)


# ----------------------------------------------------------------------------
# Deterministic parameter init (PyTorch-Conv2d-like uniform bounds), HWIO
# ----------------------------------------------------------------------------
def _init_conv(key, kh, kw, cin, cout):
    wkey, bkey = jax.random.split(key)
    bound = 1.0 / jnp.sqrt(float(cin * kh * kw))
    w = jax.random.uniform(wkey, (kh, kw, cin, cout), jnp.float32, -bound, bound)
    b = jax.random.uniform(bkey, (cout,), jnp.float32, -bound, bound)
    return w, b


def make_params(key, cin, cout):
    # Residual add in the module requires in_channels == out_channels.
    assert cin == cout
    keys = jax.random.split(key, 9)
    p = {}
    p["b1"] = (*_init_conv(keys[0], 3, 3, cin, cout),
               *_init_conv(keys[1], 3, 3, cout, cout))
    p["b2"] = (*_init_conv(keys[2], 3, 3, cout, cout),
               *_init_conv(keys[3], 3, 3, cout, cout))
    p["b3"] = (*_init_conv(keys[4], 3, 3, cout, cout),
               *_init_conv(keys[5], 3, 3, cout, cout))
    p["c1"] = _init_conv(keys[6], 1, 1, cout * 2, cout)
    p["c2"] = _init_conv(keys[7], 1, 1, cout * 3, cout)
    p["c3"] = _init_conv(keys[8], 1, 1, cout * 4, cout)
    return p


# ----------------------------------------------------------------------------
# Pure-JAX reference (lax.conv, NHWC) for correctness checking
# ----------------------------------------------------------------------------
def _ref_conv(x, w, b, pad):
    y = jax.lax.conv_general_dilated(
        x, w, window_strides=(1, 1), padding=[(pad, pad), (pad, pad)],
        dimension_numbers=("NHWC", "HWIO", "NHWC"))
    return y + b.reshape(1, 1, 1, -1)


def _ref_residual(x, params):
    w1, b1, w2, b2 = params
    h = jax.nn.relu(_ref_conv(x, w1, b1, 1))
    return jax.nn.relu(_ref_conv(h, w2, b2, 1) + x)


def _ref_carn_nhwc(x, p):
    c0 = o0 = x
    b1 = _ref_residual(o0, p["b1"])
    c1 = jnp.concatenate([c0, b1], axis=-1)
    o1 = jax.nn.relu(_ref_conv(c1, p["c1"][0], p["c1"][1], 0))
    b2 = _ref_residual(o1, p["b2"])
    c2 = jnp.concatenate([c1, b2], axis=-1)
    o2 = jax.nn.relu(_ref_conv(c2, p["c2"][0], p["c2"][1], 0))
    b3 = _ref_residual(o2, p["b3"])
    c3 = jnp.concatenate([c2, b3], axis=-1)
    o3 = jax.nn.relu(_ref_conv(c3, p["c3"][0], p["c3"][1], 0))
    return o3


# ----------------------------------------------------------------------------
if __name__ == "__main__":
    N, C, H, W = 2, 8, 16, 16          # small NCHW input, in_channels == out_channels
    key = jax.random.PRNGKey(0)
    x_key, p_key = jax.random.split(key)

    x_nchw = jax.random.normal(x_key, (N, C, H, W), jnp.float32)
    params = make_params(p_key, C, C)
    packed = pack_params(params)        # packed once, outside the jitted forward

    out = carn_forward(x_nchw, packed)
    out = jax.block_until_ready(out)
    assert out.shape == (N, C, H, W), out.shape

    # correctness vs pure-JAX reference
    x_nhwc = jnp.transpose(x_nchw, (0, 2, 3, 1))
    ref = jnp.transpose(_ref_carn_nhwc(x_nhwc, params), (0, 3, 1, 2))
    ref = jax.block_until_ready(ref)
    max_err = float(jnp.max(jnp.abs(out - ref)))
    assert jnp.allclose(out, ref, atol=1e-4, rtol=1e-4), max_err

    print("KERNEL_OK")
</pallas_src>

<mosaic_0001>
module attributes {stable_mosaic.version = 11 : i64} {
  func.func @_carn_block_kernel(%arg0: i32, %arg1: memref<1x8x256xf32, #tpu.memory_space<vmem>>, %arg2: memref<9x1x256xf32, #tpu.memory_space<vmem>>, %arg3: memref<6x9x8x8xf32, #tpu.memory_space<vmem>>, %arg4: memref<6x8x1xf32, #tpu.memory_space<vmem>>, %arg5: memref<9x8x8xf32, #tpu.memory_space<vmem>>, %arg6: memref<3x8x1xf32, #tpu.memory_space<vmem>>, %arg7: memref<1x8x256xf32, #tpu.memory_space<vmem>>) attributes {dimension_semantics = [#tpu.dimension_semantics<parallel>], iteration_bounds = array<i64: 2>, scalar_prefetch = 0 : i64, scratch_operands = 0 : i64, tpu.core_type = #tpu.core_type<tc>, window_params = [{transform_indices = @transform_0, window_bounds = array<i64: 1, 8, 256>}, {pipeline_mode = #tpu.pipeline_mode<synchronous>, transform_indices = @transform_1, window_bounds = array<i64: 9, 1, 256>}, {pipeline_mode = #tpu.pipeline_mode<synchronous>, transform_indices = @transform_2, window_bounds = array<i64: 6, 9, 8, 8>}, {pipeline_mode = #tpu.pipeline_mode<synchronous>, transform_indices = @transform_3, window_bounds = array<i64: 6, 8, 1>}, {pipeline_mode = #tpu.pipeline_mode<synchronous>, transform_indices = @transform_4, window_bounds = array<i64: 9, 8, 8>}, {pipeline_mode = #tpu.pipeline_mode<synchronous>, transform_indices = @transform_5, window_bounds = array<i64: 3, 8, 1>}, {transform_indices = @transform_6, window_bounds = array<i64: 1, 8, 256>}]} {
    %c0 = arith.constant 0 : index
    %c0_0 = arith.constant 0 : index
    %c0_1 = arith.constant 0 : index
    %0 = vector.load %arg2[%c0, %c0_0, %c0_1] : memref<9x1x256xf32, #tpu.memory_space<vmem>>, vector<1x1x256xf32>
    %1 = vector.shape_cast %0 : vector<1x1x256xf32> to vector<1x256xf32>
    %c1 = arith.constant 1 : index
    %c0_2 = arith.constant 0 : index
    %c0_3 = arith.constant 0 : index
    %2 = vector.load %arg2[%c1, %c0_2, %c0_3] : memref<9x1x256xf32, #tpu.memory_space<vmem>>, vector<1x1x256xf32>
    %3 = vector.shape_cast %2 : vector<1x1x256xf32> to vector<1x256xf32>
    %c2 = arith.constant 2 : index
    %c0_4 = arith.constant 0 : index
    %c0_5 = arith.constant 0 : index
    %4 = vector.load %arg2[%c2, %c0_4, %c0_5] : memref<9x1x256xf32, #tpu.memory_space<vmem>>, vector<1x1x256xf32>
    %5 = vector.shape_cast %4 : vector<1x1x256xf32> to vector<1x256xf32>
    %c3 = arith.constant 3 : index
    %c0_6 = arith.constant 0 : index
    %c0_7 = arith.constant 0 : index
    %6 = vector.load %arg2[%c3, %c0_6, %c0_7] : memref<9x1x256xf32, #tpu.memory_space<vmem>>, vector<1x1x256xf32>
    %7 = vector.shape_cast %6 : vector<1x1x256xf32> to vector<1x256xf32>
    %c5 = arith.constant 5 : index
    %c0_8 = arith.constant 0 : index
    %c0_9 = arith.constant 0 : index
    %8 = vector.load %arg2[%c5, %c0_8, %c0_9] : memref<9x1x256xf32, #tpu.memory_space<vmem>>, vector<1x1x256xf32>
    %9 = vector.shape_cast %8 : vector<1x1x256xf32> to vector<1x256xf32>
    %c6 = arith.constant 6 : index
    %c0_10 = arith.constant 0 : index
    %c0_11 = arith.constant 0 : index
    %10 = vector.load %arg2[%c6, %c0_10, %c0_11] : memref<9x1x256xf32, #tpu.memory_space<vmem>>, vector<1x1x256xf32>
    %11 = vector.shape_cast %10 : vector<1x1x256xf32> to vector<1x256xf32>
    %c7 = arith.constant 7 : index
    %c0_12 = arith.constant 0 : index
    %c0_13 = arith.constant 0 : index
    %12 = vector.load %arg2[%c7, %c0_12, %c0_13] : memref<9x1x256xf32, #tpu.memory_space<vmem>>, vector<1x1x256xf32>
    %13 = vector.shape_cast %12 : vector<1x1x256xf32> to vector<1x256xf32>
    %c8 = arith.constant 8 : index
    %c0_14 = arith.constant 0 : index
    %c0_15 = arith.constant 0 : index
    %14 = vector.load %arg2[%c8, %c0_14, %c0_15] : memref<9x1x256xf32, #tpu.memory_space<vmem>>, vector<1x1x256xf32>
    %15 = vector.shape_cast %14 : vector<1x1x256xf32> to vector<1x256xf32>
    %c0_16 = arith.constant 0 : index
    %c0_17 = arith.constant 0 : index
    %c0_18 = arith.constant 0 : index
    %16 = vector.load %arg1[%c0_16, %c0_17, %c0_18] : memref<1x8x256xf32, #tpu.memory_space<vmem>>, vector<1x8x256xf32>
    %17 = vector.shape_cast %16 : vector<1x8x256xf32> to vector<8x256xf32>
    %c17_i32 = arith.constant 17 : i32
    %18 = tpu.dynamic_rotate %17 by %c17_i32 dim 1 : vector<8x256xf32>, i32 -> vector<8x256xf32>
    %19 = vector.broadcast %1 : vector<1x256xf32> to vector<8x256xf32>
    %20 = arith.mulf %18, %19 : vector<8x256xf32>
    %c0_19 = arith.constant 0 : index
    %c0_20 = arith.constant 0 : index
    %c0_21 = arith.constant 0 : index
    %c0_22 = arith.constant 0 : index
    %21 = vector.load %arg3[%c0_19, %c0_20, %c0_21, %c0_22] : memref<6x9x8x8xf32, #tpu.memory_space<vmem>>, vector<1x1x8x8xf32>
    %22 = vector.shape_cast %21 : vector<1x1x8x8xf32> to vector<8x8xf32>
    %cst = arith.constant dense<0.000000e+00> : vector<8x256xf32>
    %23 = tpu.matmul %22, %20, %cst {dimension_numbers = #tpu.dot_dimension_numbers<[1], [0], [0], [1], [0, 0, 1, 1], [], []>} : vector<8x8xf32>, vector<8x256xf32>, vector<8x256xf32> -> vector<8x256xf32>
    %c16_i32 = arith.constant 16 : i32
    %24 = tpu.dynamic_rotate %17 by %c16_i32 dim 1 : vector<8x256xf32>, i32 -> vector<8x256xf32>
    %25 = vector.broadcast %3 : vector<1x256xf32> to vector<8x256xf32>
    %26 = arith.mulf %24, %25 : vector<8x256xf32>
    %c0_23 = arith.constant 0 : index
    %c1_24 = arith.constant 1 : index
    %c0_25 = arith.constant 0 : index
    %c0_26 = arith.constant 0 : index
    %27 = vector.load %arg3[%c0_23, %c1_24, %c0_25, %c0_26] : memref<6x9x8x8xf32, #tpu.memory_space<vmem>>, vector<1x1x8x8xf32>
    %28 = vector.shape_cast %27 : vector<1x1x8x8xf32> to vector<8x8xf32>
    %cst_27 = arith.constant dense<0.000000e+00> : vector<8x256xf32>
    %29 = tpu.matmul %28, %26, %cst_27 {dimension_numbers = #tpu.dot_dimension_numbers<[1], [0], [0], [1], [0, 0, 1, 1], [], []>} : vector<8x8xf32>, vector<8x256xf32>, vector<8x256xf32> -> vector<8x256xf32>
    %30 = arith.addf %23, %29 : vector<8x256xf32>
    %c15_i32 = arith.constant 15 : i32
    %31 = tpu.dynamic_rotate %17 by %c15_i32 dim 1 : vector<8x256xf32>, i32 -> vector<8x256xf32>
    %32 = vector.broadcast %5 : vector<1x256xf32> to vector<8x256xf32>
    %33 = arith.mulf %31, %32 : vector<8x256xf32>
    %c0_28 = arith.constant 0 : index
    %c2_29 = arith.constant 2 : index
    %c0_30 = arith.constant 0 : index
    %c0_31 = arith.constant 0 : index
    %34 = vector.load %arg3[%c0_28, %c2_29, %c0_30, %c0_31] : memref<6x9x8x8xf32, #tpu.memory_space<vmem>>, vector<1x1x8x8xf32>
    %35 = vector.shape_cast %34 : vector<1x1x8x8xf32> to vector<8x8xf32>
    %cst_32 = arith.constant dense<0.000000e+00> : vector<8x256xf32>
    %36 = tpu.matmul %35, %33, %cst_32 {dimension_numbers = #tpu.dot_dimension_numbers<[1], [0], [0], [1], [0, 0, 1, 1], [], []>} : vector<8x8xf32>, vector<8x256xf32>, vector<8x256xf32> -> vector<8x256xf32>
    %37 = arith.addf %30, %36 : vector<8x256xf32>
    %c1_i32 = arith.constant 1 : i32
    %38 = tpu.dynamic_rotate %17 by %c1_i32 dim 1 : vector<8x256xf32>, i32 -> vector<8x256xf32>
    %39 = vector.broadcast %7 : vector<1x256xf32> to vector<8x256xf32>
    %40 = arith.mulf %38, %39 : vector<8x256xf32>
    %c0_33 = arith.constant 0 : index
    %c3_34 = arith.constant 3 : index
    %c0_35 = arith.constant 0 : index
    %c0_36 = arith.constant 0 : index
    %41 = vector.load %arg3[%c0_33, %c3_34, %c0_35, %c0_36] : memref<6x9x8x8xf32, #tpu.memory_space<vmem>>, vector<1x1x8x8xf32>
    %42 = vector.shape_cast %41 : vector<1x1x8x8xf32> to vector<8x8xf32>
    %cst_37 = arith.constant dense<0.000000e+00> : vector<8x256xf32>
    %43 = tpu.matmul %42, %40, %cst_37 {dimension_numbers = #tpu.dot_dimension_numbers<[1], [0], [0], [1], [0, 0, 1, 1], [], []>} : vector<8x8xf32>, vector<8x256xf32>, vector<8x256xf32> -> vector<8x256xf32>
    %44 = arith.addf %37, %43 : vector<8x256xf32>
    %c0_38 = arith.constant 0 : index
    %c4 = arith.constant 4 : index
    %c0_39 = arith.constant 0 : index
    %c0_40 = arith.constant 0 : index
    %45 = vector.load %arg3[%c0_38, %c4, %c0_39, %c0_40] : memref<6x9x8x8xf32, #tpu.memory_space<vmem>>, vector<1x1x8x8xf32>
    %46 = vector.shape_cast %45 : vector<1x1x8x8xf32> to vector<8x8xf32>
    %cst_41 = arith.constant dense<0.000000e+00> : vector<8x256xf32>
    %47 = tpu.matmul %46, %17, %cst_41 {dimension_numbers = #tpu.dot_dimension_numbers<[1], [0], [0], [1], [0, 0, 1, 1], [], []>} : vector<8x8xf32>, vector<8x256xf32>, vector<8x256xf32> -> vector<8x256xf32>
    %48 = arith.addf %44, %47 : vector<8x256xf32>
    %c255_i32 = arith.constant 255 : i32
    %49 = tpu.dynamic_rotate %17 by %c255_i32 dim 1 : vector<8x256xf32>, i32 -> vector<8x256xf32>
    %50 = vector.broadcast %9 : vector<1x256xf32> to vector<8x256xf32>
    %51 = arith.mulf %49, %50 : vector<8x256xf32>
    %c0_42 = arith.constant 0 : index
    %c5_43 = arith.constant 5 : index
    %c0_44 = arith.constant 0 : index
    %c0_45 = arith.constant 0 : index
    %52 = vector.load %arg3[%c0_42, %c5_43, %c0_44, %c0_45] : memref<6x9x8x8xf32, #tpu.memory_space<vmem>>, vector<1x1x8x8xf32>
    %53 = vector.shape_cast %52 : vector<1x1x8x8xf32> to vector<8x8xf32>
    %cst_46 = arith.constant dense<0.000000e+00> : vector<8x256xf32>
    %54 = tpu.matmul %53, %51, %cst_46 {dimension_numbers = #tpu.dot_dimension_numbers<[1], [0], [0], [1], [0, 0, 1, 1], [], []>} : vector<8x8xf32>, vector<8x256xf32>, vector<8x256xf32> -> vector<8x256xf32>
    %55 = arith.addf %48, %54 : vector<8x256xf32>
    %c241_i32 = arith.constant 241 : i32
    %56 = tpu.dynamic_rotate %17 by %c241_i32 dim 1 : vector<8x256xf32>, i32 -> vector<8x256xf32>
    %57 = vector.broadcast %11 : vector<1x256xf32> to vector<8x256xf32>
    %58 = arith.mulf %56, %57 : vector<8x256xf32>
    %c0_47 = arith.constant 0 : index
    %c6_48 = arith.constant 6 : index
    %c0_49 = arith.constant 0 : index
    %c0_50 = arith.constant 0 : index
    %59 = vector.load %arg3[%c0_47, %c6_48, %c0_49, %c0_50] : memref<6x9x8x8xf32, #tpu.memory_space<vmem>>, vector<1x1x8x8xf32>
    %60 = vector.shape_cast %59 : vector<1x1x8x8xf32> to vector<8x8xf32>
    %cst_51 = arith.constant dense<0.000000e+00> : vector<8x256xf32>
    %61 = tpu.matmul %60, %58, %cst_51 {dimension_numbers = #tpu.dot_dimension_numbers<[1], [0], [0], [1], [0, 0, 1, 1], [], []>} : vector<8x8xf32>, vector<8x256xf32>, vector<8x256xf32> -> vector<8x256xf32>
    %62 = arith.addf %55, %61 : vector<8x256xf32>
    %c240_i32 = arith.constant 240 : i32
    %63 = tpu.dynamic_rotate %17 by %c240_i32 dim 1 : vector<8x256xf32>, i32 -> vector<8x256xf32>
    %64 = vector.broadcast %13 : vector<1x256xf32> to vector<8x256xf32>
    %65 = arith.mulf %63, %64 : vector<8x256xf32>
    %c0_52 = arith.constant 0 : index
    %c7_53 = arith.constant 7 : index
    %c0_54 = arith.constant 0 : index
    %c0_55 = arith.constant 0 : index
    %66 = vector.load %arg3[%c0_52, %c7_53, %c0_54, %c0_55] : memref<6x9x8x8xf32, #tpu.memory_space<vmem>>, vector<1x1x8x8xf32>
    %67 = vector.shape_cast %66 : vector<1x1x8x8xf32> to vector<8x8xf32>
    %cst_56 = arith.constant dense<0.000000e+00> : vector<8x256xf32>
    %68 = tpu.matmul %67, %65, %cst_56 {dimension_numbers = #tpu.dot_dimension_numbers<[1], [0], [0], [1], [0, 0, 1, 1], [], []>} : vector<8x8xf32>, vector<8x256xf32>, vector<8x256xf32> -> vector<8x256xf32>
    %69 = arith.addf %62, %68 : vector<8x256xf32>
    %c239_i32 = arith.constant 239 : i32
    %70 = tpu.dynamic_rotate %17 by %c239_i32 dim 1 : vector<8x256xf32>, i32 -> vector<8x256xf32>
    %71 = vector.broadcast %15 : vector<1x256xf32> to vector<8x256xf32>
    %72 = arith.mulf %70, %71 : vector<8x256xf32>
    %c0_57 = arith.constant 0 : index
    %c8_58 = arith.constant 8 : index
    %c0_59 = arith.constant 0 : index
    %c0_60 = arith.constant 0 : index
    %73 = vector.load %arg3[%c0_57, %c8_58, %c0_59, %c0_60] : memref<6x9x8x8xf32, #tpu.memory_space<vmem>>, vector<1x1x8x8xf32>
    %74 = vector.shape_cast %73 : vector<1x1x8x8xf32> to vector<8x8xf32>
    %cst_61 = arith.constant dense<0.000000e+00> : vector<8x256xf32>
    %75 = tpu.matmul %74, %72, %cst_61 {dimension_numbers = #tpu.dot_dimension_numbers<[1], [0], [0], [1], [0, 0, 1, 1], [], []>} : vector<8x8xf32>, vector<8x256xf32>, vector<8x256xf32> -> vector<8x256xf32>
    %76 = arith.addf %69, %75 : vector<8x256xf32>
    %c0_62 = arith.constant 0 : index
    %c0_63 = arith.constant 0 : index
    %c0_64 = arith.constant 0 : index
    %77 = vector.load %arg4[%c0_62, %c0_63, %c0_64] : memref<6x8x1xf32, #tpu.memory_space<vmem>>, vector<1x8x1xf32>
    %78 = vector.shape_cast %77 : vector<1x8x1xf32> to vector<8x1xf32>
    %79 = vector.broadcast %78 : vector<8x1xf32> to vector<8x256xf32>
    %80 = arith.addf %76, %79 : vector<8x256xf32>
    %cst_65 = arith.constant 0.000000e+00 : f32
    %81 = vector.broadcast %cst_65 : f32 to vector<8x256xf32>
    %82 = arith.maximumf %80, %81 : vector<8x256xf32>
    %c17_i32_66 = arith.constant 17 : i32
    %83 = tpu.dynamic_rotate %82 by %c17_i32_66 dim 1 : vector<8x256xf32>, i32 -> vector<8x256xf32>
    %84 = vector.broadcast %1 : vector<1x256xf32> to vector<8x256xf32>
    %85 = arith.mulf %83, %84 : vector<8x256xf32>
    %c1_67 = arith.constant 1 : index
    %c0_68 = arith.constant 0 : index
    %c0_69 = arith.constant 0 : index
    %c0_70 = arith.constant 0 : index
    %86 = vector.load %arg3[%c1_67, %c0_68, %c0_69, %c0_70] : memref<6x9x8x8xf32, #tpu.memory_space<vmem>>, vector<1x1x8x8xf32>
    %87 = vector.shape_cast %86 : vector<1x1x8x8xf32> to vector<8x8xf32>
    %cst_71 = arith.constant dense<0.000000e+00> : vector<8x256xf32>
    %88 = tpu.matmul %87, %85, %cst_71 {dimension_numbers = #tpu.dot_dimension_numbers<[1], [0], [0], [1], [0, 0, 1, 1], [], []>} : vector<8x8xf32>, vector<8x256xf32>, vector<8x256xf32> -> vector<8x256xf32>
    %c16_i32_72 = arith.constant 16 : i32
    %89 = tpu.dynamic_rotate %82 by %c16_i32_72 dim 1 : vector<8x256xf32>, i32 -> vector<8x256xf32>
    %90 = vector.broadcast %3 : vector<1x256xf32> to vector<8x256xf32>
    %91 = arith.mulf %89, %90 : vector<8x256xf32>
    %c1_73 = arith.constant 1 : index
    %c1_74 = arith.constant 1 : index
    %c0_75 = arith.constant 0 : index
    %c0_76 = arith.constant 0 : index
    %92 = vector.load %arg3[%c1_73, %c1_74, %c0_75, %c0_76] : memref<6x9x8x8xf32, #tpu.memory_space<vmem>>, vector<1x1x8x8xf32>
    %93 = vector.shape_cast %92 : vector<1x1x8x8xf32> to vector<8x8xf32>
    %cst_77 = arith.constant dense<0.000000e+00> : vector<8x256xf32>
    %94 = tpu.matmul %93, %91, %cst_77 {dimension_numbers = #tpu.dot_dimension_numbers<[1], [0], [0], [1], [0, 0, 1, 1], [], []>} : vector<8x8xf32>, vector<8x256xf32>, vector<8x256xf32> -> vector<8x256xf32>
    %95 = arith.addf %88, %94 : vector<8x256xf32>
    %c15_i32_78 = arith.constant 15 : i32
    %96 = tpu.dynamic_rotate %82 by %c15_i32_78 dim 1 : vector<8x256xf32>, i32 -> vector<8x256xf32>
    %97 = vector.broadcast %5 : vector<1x256xf32> to vector<8x256xf32>
    %98 = arith.mulf %96, %97 : vector<8x256xf32>
    %c1_79 = arith.constant 1 : index
    %c2_80 = arith.constant 2 : index
    %c0_81 = arith.constant 0 : index
    %c0_82 = arith.constant 0 : index
    %99 = vector.load %arg3[%c1_79, %c2_80, %c0_81, %c0_82] : memref<6x9x8x8xf32, #tpu.memory_space<vmem>>, vector<1x1x8x8xf32>
    %100 = vector.shape_cast %99 : vector<1x1x8x8xf32> to vector<8x8xf32>
    %cst_83 = arith.constant dense<0.000000e+00> : vector<8x256xf32>
    %101 = tpu.matmul %100, %98, %cst_83 {dimension_numbers = #tpu.dot_dimension_numbers<[1], [0], [0], [1], [0, 0, 1, 1], [], []>} : vector<8x8xf32>, vector<8x256xf32>, vector<8x256xf32> -> vector<8x256xf32>
    %102 = arith.addf %95, %101 : vector<8x256xf32>
    %c1_i32_84 = arith.constant 1 : i32
    %103 = tpu.dynamic_rotate %82 by %c1_i32_84 dim 1 : vector<8x256xf32>, i32 -> vector<8x256xf32>
    %104 = vector.broadcast %7 : vector<1x256xf32> to vector<8x256xf32>
    %105 = arith.mulf %103, %104 : vector<8x256xf32>
    %c1_85 = arith.constant 1 : index
    %c3_86 = arith.constant 3 : index
    %c0_87 = arith.constant 0 : index
    %c0_88 = arith.constant 0 : index
    %106 = vector.load %arg3[%c1_85, %c3_86, %c0_87, %c0_88] : memref<6x9x8x8xf32, #tpu.memory_space<vmem>>, vector<1x1x8x8xf32>
    %107 = vector.shape_cast %106 : vector<1x1x8x8xf32> to vector<8x8xf32>
    %cst_89 = arith.constant dense<0.000000e+00> : vector<8x256xf32>
    %108 = tpu.matmul %107, %105, %cst_89 {dimension_numbers = #tpu.dot_dimension_numbers<[1], [0], [0], [1], [0, 0, 1, 1], [], []>} : vector<8x8xf32>, vector<8x256xf32>, vector<8x256xf32> -> vector<8x256xf32>
    %109 = arith.addf %102, %108 : vector<8x256xf32>
    %c1_90 = arith.constant 1 : index
    %c4_91 = arith.constant 4 : index
    %c0_92 = arith.constant 0 : index
    %c0_93 = arith.constant 0 : index
    %110 = vector.load %arg3[%c1_90, %c4_91, %c0_92, %c0_93] : memref<6x9x8x8xf32, #tpu.memory_space<vmem>>, vector<1x1x8x8xf32>
    %111 = vector.shape_cast %110 : vector<1x1x8x8xf32> to vector<8x8xf32>
    %cst_94 = arith.constant dense<0.000000e+00> : vector<8x256xf32>
    %112 = tpu.matmul %111, %82, %cst_94 {dimension_numbers = #tpu.dot_dimension_numbers<[1], [0], [0], [1], [0, 0, 1, 1], [], []>} : vector<8x8xf32>, vector<8x256xf32>, vector<8x256xf32> -> vector<8x256xf32>
    %113 = arith.addf %109, %112 : vector<8x256xf32>
    %c255_i32_95 = arith.constant 255 : i32
    %114 = tpu.dynamic_rotate %82 by %c255_i32_95 dim 1 : vector<8x256xf32>, i32 -> vector<8x256xf32>
    %115 = vector.broadcast %9 : vector<1x256xf32> to vector<8x256xf32>
    %116 = arith.mulf %114, %115 : vector<8x256xf32>
    %c1_96 = arith.constant 1 : index
    %c5_97 = arith.constant 5 : index
    %c0_98 = arith.constant 0 : index
    %c0_99 = arith.constant 0 : index
    %117 = vector.load %arg3[%c1_96, %c5_97, %c0_98, %c0_99] : memref<6x9x8x8xf32, #tpu.memory_space<vmem>>, vector<1x1x8x8xf32>
    %118 = vector.shape_cast %117 : vector<1x1x8x8xf32> to vector<8x8xf32>
    %cst_100 = arith.constant dense<0.000000e+00> : vector<8x256xf32>
    %119 = tpu.matmul %118, %116, %cst_100 {dimension_numbers = #tpu.dot_dimension_numbers<[1], [0], [0], [1], [0, 0, 1, 1], [], []>} : vector<8x8xf32>, vector<8x256xf32>, vector<8x256xf32> -> vector<8x256xf32>
    %120 = arith.addf %113, %119 : vector<8x256xf32>
    %c241_i32_101 = arith.constant 241 : i32
    %121 = tpu.dynamic_rotate %82 by %c241_i32_101 dim 1 : vector<8x256xf32>, i32 -> vector<8x256xf32>
    %122 = vector.broadcast %11 : vector<1x256xf32> to vector<8x256xf32>
    %123 = arith.mulf %121, %122 : vector<8x256xf32>
    %c1_102 = arith.constant 1 : index
    %c6_103 = arith.constant 6 : index
    %c0_104 = arith.constant 0 : index
    %c0_105 = arith.constant 0 : index
    %124 = vector.load %arg3[%c1_102, %c6_103, %c0_104, %c0_105] : memref<6x9x8x8xf32, #tpu.memory_space<vmem>>, vector<1x1x8x8xf32>
    %125 = vector.shape_cast %124 : vector<1x1x8x8xf32> to vector<8x8xf32>
    %cst_106 = arith.constant dense<0.000000e+00> : vector<8x256xf32>
    %126 = tpu.matmul %125, %123, %cst_106 {dimension_numbers = #tpu.dot_dimension_numbers<[1], [0], [0], [1], [0, 0, 1, 1], [], []>} : vector<8x8xf32>, vector<8x256xf32>, vector<8x256xf32> -> vector<8x256xf32>
    %127 = arith.addf %120, %126 : vector<8x256xf32>
    %c240_i32_107 = arith.constant 240 : i32
    %128 = tpu.dynamic_rotate %82 by %c240_i32_107 dim 1 : vector<8x256xf32>, i32 -> vector<8x256xf32>
    %129 = vector.broadcast %13 : vector<1x256xf32> to vector<8x256xf32>
    %130 = arith.mulf %128, %129 : vector<8x256xf32>
    %c1_108 = arith.constant 1 : index
    %c7_109 = arith.constant 7 : index
    %c0_110 = arith.constant 0 : index
    %c0_111 = arith.constant 0 : index
    %131 = vector.load %arg3[%c1_108, %c7_109, %c0_110, %c0_111] : memref<6x9x8x8xf32, #tpu.memory_space<vmem>>, vector<1x1x8x8xf32>
    %132 = vector.shape_cast %131 : vector<1x1x8x8xf32> to vector<8x8xf32>
    %cst_112 = arith.constant dense<0.000000e+00> : vector<8x256xf32>
    %133 = tpu.matmul %132, %130, %cst_112 {dimension_numbers = #tpu.dot_dimension_numbers<[1], [0], [0], [1], [0, 0, 1, 1], [], []>} : vector<8x8xf32>, vector<8x256xf32>, vector<8x256xf32> -> vector<8x256xf32>
    %134 = arith.addf %127, %133 : vector<8x256xf32>
    %c239_i32_113 = arith.constant 239 : i32
    %135 = tpu.dynamic_rotate %82 by %c239_i32_113 dim 1 : vector<8x256xf32>, i32 -> vector<8x256xf32>
    %136 = vector.broadcast %15 : vector<1x256xf32> to vector<8x256xf32>
    %137 = arith.mulf %135, %136 : vector<8x256xf32>
    %c1_114 = arith.constant 1 : index
    %c8_115 = arith.constant 8 : index
    %c0_116 = arith.constant 0 : index
    %c0_117 = arith.constant 0 : index
    %138 = vector.load %arg3[%c1_114, %c8_115, %c0_116, %c0_117] : memref<6x9x8x8xf32, #tpu.memory_space<vmem>>, vector<1x1x8x8xf32>
    %139 = vector.shape_cast %138 : vector<1x1x8x8xf32> to vector<8x8xf32>
    %cst_118 = arith.constant dense<0.000000e+00> : vector<8x256xf32>
    %140 = tpu.matmul %139, %137, %cst_118 {dimension_numbers = #tpu.dot_dimension_numbers<[1], [0], [0], [1], [0, 0, 1, 1], [], []>} : vector<8x8xf32>, vector<8x256xf32>, vector<8x256xf32> -> vector<8x256xf32>
    %141 = arith.addf %134, %140 : vector<8x256xf32>
    %c1_119 = arith.constant 1 : index
    %c0_120 = arith.constant 0 : index
    %c0_121 = arith.constant 0 : index
    %142 = vector.load %arg4[%c1_119, %c0_120, %c0_121] : memref<6x8x1xf32, #tpu.memory_space<vmem>>, vector<1x8x1xf32>
    %143 = vector.shape_cast %142 : vector<1x8x1xf32> to vector<8x1xf32>
    %144 = vector.broadcast %143 : vector<8x1xf32> to vector<8x256xf32>
    %145 = arith.addf %141, %144 : vector<8x256xf32>
    %146 = arith.addf %145, %17 : vector<8x256xf32>
    %cst_122 = arith.constant 0.000000e+00 : f32
    %147 = vector.broadcast %cst_122 : f32 to vector<8x256xf32>
    %148 = arith.maximumf %146, %147 : vector<8x256xf32>
    %c0_123 = arith.constant 0 : index
    %c0_124 = arith.constant 0 : index
    %c0_125 = arith.constant 0 : index
    %149 = vector.load %arg6[%c0_123, %c0_124, %c0_125] : memref<3x8x1xf32, #tpu.memory_space<vmem>>, vector<1x8x1xf32>
    %150 = vector.shape_cast %149 : vector<1x8x1xf32> to vector<8x1xf32>
    %c0_126 = arith.constant 0 : index
    %c0_127 = arith.constant 0 : index
    %c0_128 = arith.constant 0 : index
    %151 = vector.load %arg5[%c0_126, %c0_127, %c0_128] : memref<9x8x8xf32, #tpu.memory_space<vmem>>, vector<1x8x8xf32>
    %152 = vector.shape_cast %151 : vector<1x8x8xf32> to vector<8x8xf32>
    %cst_129 = arith.constant dense<0.000000e+00> : vector<8x256xf32>
    %153 = tpu.matmul %152, %17, %cst_129 {dimension_numbers = #tpu.dot_dimension_numbers<[1], [0], [0], [1], [0, 0, 1, 1], [], []>} : vector<8x8xf32>, vector<8x256xf32>, vector<8x256xf32> -> vector<8x256xf32>
    %154 = vector.broadcast %150 : vector<8x1xf32> to vector<8x256xf32>
    %155 = arith.addf %154, %153 : vector<8x256xf32>
    %c1_130 = arith.constant 1 : index
    %c0_131 = arith.constant 0 : index
    %c0_132 = arith.constant 0 : index
    %156 = vector.load %arg5[%c1_130, %c0_131, %c0_132] : memref<9x8x8xf32, #tpu.memory_space<vmem>>, vector<1x8x8xf32>
    %157 = vector.shape_cast %156 : vector<1x8x8xf32> to vector<8x8xf32>
    %cst_133 = arith.constant dense<0.000000e+00> : vector<8x256xf32>
    %158 = tpu.matmul %157, %148, %cst_133 {dimension_numbers = #tpu.dot_dimension_numbers<[1], [0], [0], [1], [0, 0, 1, 1], [], []>} : vector<8x8xf32>, vector<8x256xf32>, vector<8x256xf32> -> vector<8x256xf32>
    %159 = arith.addf %155, %158 : vector<8x256xf32>
    %cst_134 = arith.constant 0.000000e+00 : f32
    %160 = vector.broadcast %cst_134 : f32 to vector<8x256xf32>
    %161 = arith.maximumf %159, %160 : vector<8x256xf32>
    %c17_i32_135 = arith.constant 17 : i32
    %162 = tpu.dynamic_rotate %161 by %c17_i32_135 dim 1 : vector<8x256xf32>, i32 -> vector<8x256xf32>
    %163 = vector.broadcast %1 : vector<1x256xf32> to vector<8x256xf32>
    %164 = arith.mulf %162, %163 : vector<8x256xf32>
    %c2_136 = arith.constant 2 : index
    %c0_137 = arith.constant 0 : index
    %c0_138 = arith.constant 0 : index
    %c0_139 = arith.constant 0 : index
    %165 = vector.load %arg3[%c2_136, %c0_137, %c0_138, %c0_139] : memref<6x9x8x8xf32, #tpu.memory_space<vmem>>, vector<1x1x8x8xf32>
    %166 = vector.shape_cast %165 : vector<1x1x8x8xf32> to vector<8x8xf32>
    %cst_140 = arith.constant dense<0.000000e+00> : vector<8x256xf32>
    %167 = tpu.matmul %166, %164, %cst_140 {dimension_numbers = #tpu.dot_dimension_numbers<[1], [0], [0], [1], [0, 0, 1, 1], [], []>} : vector<8x8xf32>, vector<8x256xf32>, vector<8x256xf32> -> vector<8x256xf32>
    %c16_i32_141 = arith.constant 16 : i32
    %168 = tpu.dynamic_rotate %161 by %c16_i32_141 dim 1 : vector<8x256xf32>, i32 -> vector<8x256xf32>
    %169 = vector.broadcast %3 : vector<1x256xf32> to vector<8x256xf32>
    %170 = arith.mulf %168, %169 : vector<8x256xf32>
    %c2_142 = arith.constant 2 : index
    %c1_143 = arith.constant 1 : index
    %c0_144 = arith.constant 0 : index
    %c0_145 = arith.constant 0 : index
    %171 = vector.load %arg3[%c2_142, %c1_143, %c0_144, %c0_145] : memref<6x9x8x8xf32, #tpu.memory_space<vmem>>, vector<1x1x8x8xf32>
    %172 = vector.shape_cast %171 : vector<1x1x8x8xf32> to vector<8x8xf32>
    %cst_146 = arith.constant dense<0.000000e+00> : vector<8x256xf32>
    %173 = tpu.matmul %172, %170, %cst_146 {dimension_numbers = #tpu.dot_dimension_numbers<[1], [0], [0], [1], [0, 0, 1, 1], [], []>} : vector<8x8xf32>, vector<8x256xf32>, vector<8x256xf32> -> vector<8x256xf32>
    %174 = arith.addf %167, %173 : vector<8x256xf32>
    %c15_i32_147 = arith.constant 15 : i32
    %175 = tpu.dynamic_rotate %161 by %c15_i32_147 dim 1 : vector<8x256xf32>, i32 -> vector<8x256xf32>
    %176 = vector.broadcast %5 : vector<1x256xf32> to vector<8x256xf32>
    %177 = arith.mulf %175, %176 : vector<8x256xf32>
    %c2_148 = arith.constant 2 : index
    %c2_149 = arith.constant 2 : index
    %c0_150 = arith.constant 0 : index
    %c0_151 = arith.constant 0 : index
    %178 = vector.load %arg3[%c2_148, %c2_149, %c0_150, %c0_151] : memref<6x9x8x8xf32, #tpu.memory_space<vmem>>, vector<1x1x8x8xf32>
    %179 = vector.shape_cast %178 : vector<1x1x8x8xf32> to vector<8x8xf32>
    %cst_152 = arith.constant dense<0.000000e+00> : vector<8x256xf32>
    %180 = tpu.matmul %179, %177, %cst_152 {dimension_numbers = #tpu.dot_dimension_numbers<[1], [0], [0], [1], [0, 0, 1, 1], [], []>} : vector<8x8xf32>, vector<8x256xf32>, vector<8x256xf32> -> vector<8x256xf32>
    %181 = arith.addf %174, %180 : vector<8x256xf32>
    %c1_i32_153 = arith.constant 1 : i32
    %182 = tpu.dynamic_rotate %161 by %c1_i32_153 dim 1 : vector<8x256xf32>, i32 -> vector<8x256xf32>
    %183 = vector.broadcast %7 : vector<1x256xf32> to vector<8x256xf32>
    %184 = arith.mulf %182, %183 : vector<8x256xf32>
    %c2_154 = arith.constant 2 : index
    %c3_155 = arith.constant 3 : index
    %c0_156 = arith.constant 0 : index
    %c0_157 = arith.constant 0 : index
    %185 = vector.load %arg3[%c2_154, %c3_155, %c0_156, %c0_157] : memref<6x9x8x8xf32, #tpu.memory_space<vmem>>, vector<1x1x8x8xf32>
    %186 = vector.shape_cast %185 : vector<1x1x8x8xf32> to vector<8x8xf32>
    %cst_158 = arith.constant dense<0.000000e+00> : vector<8x256xf32>
    %187 = tpu.matmul %186, %184, %cst_158 {dimension_numbers = #tpu.dot_dimension_numbers<[1], [0], [0], [1], [0, 0, 1, 1], [], []>} : vector<8x8xf32>, vector<8x256xf32>, vector<8x256xf32> -> vector<8x256xf32>
    %188 = arith.addf %181, %187 : vector<8x256xf32>
    %c2_159 = arith.constant 2 : index
    %c4_160 = arith.constant 4 : index
    %c0_161 = arith.constant 0 : index
    %c0_162 = arith.constant 0 : index
    %189 = vector.load %arg3[%c2_159, %c4_160, %c0_161, %c0_162] : memref<6x9x8x8xf32, #tpu.memory_space<vmem>>, vector<1x1x8x8xf32>
    %190 = vector.shape_cast %189 : vector<1x1x8x8xf32> to vector<8x8xf32>
    %cst_163 = arith.constant dense<0.000000e+00> : vector<8x256xf32>
    %191 = tpu.matmul %190, %161, %cst_163 {dimension_numbers = #tpu.dot_dimension_numbers<[1], [0], [0], [1], [0, 0, 1, 1], [], []>} : vector<8x8xf32>, vector<8x256xf32>, vector<8x256xf32> -> vector<8x256xf32>
    %192 = arith.addf %188, %191 : vector<8x256xf32>
    %c255_i32_164 = arith.constant 255 : i32
    %193 = tpu.dynamic_rotate %161 by %c255_i32_164 dim 1 : vector<8x256xf32>, i32 -> vector<8x256xf32>
    %194 = vector.broadcast %9 : vector<1x256xf32> to vector<8x256xf32>
    %195 = arith.mulf %193, %194 : vector<8x256xf32>
    %c2_165 = arith.constant 2 : index
    %c5_166 = arith.constant 5 : index
    %c0_167 = arith.constant 0 : index
    %c0_168 = arith.constant 0 : index
    %196 = vector.load %arg3[%c2_165, %c5_166, %c0_167, %c0_168] : memref<6x9x8x8xf32, #tpu.memory_space<vmem>>, vector<1x1x8x8xf32>
    %197 = vector.shape_cast %196 : vector<1x1x8x8xf32> to vector<8x8xf32>
    %cst_169 = arith.constant dense<0.000000e+00> : vector<8x256xf32>
    %198 = tpu.matmul %197, %195, %cst_169 {dimension_numbers = #tpu.dot_dimension_numbers<[1], [0], [0], [1], [0, 0, 1, 1], [], []>} : vector<8x8xf32>, vector<8x256xf32>, vector<8x256xf32> -> vector<8x256xf32>
    %199 = arith.addf %192, %198 : vector<8x256xf32>
    %c241_i32_170 = arith.constant 241 : i32
    %200 = tpu.dynamic_rotate %161 by %c241_i32_170 dim 1 : vector<8x256xf32>, i32 -> vector<8x256xf32>
    %201 = vector.broadcast %11 : vector<1x256xf32> to vector<8x256xf32>
    %202 = arith.mulf %200, %201 : vector<8x256xf32>
    %c2_171 = arith.constant 2 : index
    %c6_172 = arith.constant 6 : index
    %c0_173 = arith.constant 0 : index
    %c0_174 = arith.constant 0 : index
    %203 = vector.load %arg3[%c2_171, %c6_172, %c0_173, %c0_174] : memref<6x9x8x8xf32, #tpu.memory_space<vmem>>, vector<1x1x8x8xf32>
    %204 = vector.shape_cast %203 : vector<1x1x8x8xf32> to vector<8x8xf32>
    %cst_175 = arith.constant dense<0.000000e+00> : vector<8x256xf32>
    %205 = tpu.matmul %204, %202, %cst_175 {dimension_numbers = #tpu.dot_dimension_numbers<[1], [0], [0], [1], [0, 0, 1, 1], [], []>} : vector<8x8xf32>, vector<8x256xf32>, vector<8x256xf32> -> vector<8x256xf32>
    %206 = arith.addf %199, %205 : vector<8x256xf32>
    %c240_i32_176 = arith.constant 240 : i32
    %207 = tpu.dynamic_rotate %161 by %c240_i32_176 dim 1 : vector<8x256xf32>, i32 -> vector<8x256xf32>
    %208 = vector.broadcast %13 : vector<1x256xf32> to vector<8x256xf32>
    %209 = arith.mulf %207, %208 : vector<8x256xf32>
    %c2_177 = arith.constant 2 : index
    %c7_178 = arith.constant 7 : index
    %c0_179 = arith.constant 0 : index
    %c0_180 = arith.constant 0 : index
    %210 = vector.load %arg3[%c2_177, %c7_178, %c0_179, %c0_180] : memref<6x9x8x8xf32, #tpu.memory_space<vmem>>, vector<1x1x8x8xf32>
    %211 = vector.shape_cast %210 : vector<1x1x8x8xf32> to vector<8x8xf32>
    %cst_181 = arith.constant dense<0.000000e+00> : vector<8x256xf32>
    %212 = tpu.matmul %211, %209, %cst_181 {dimension_numbers = #tpu.dot_dimension_numbers<[1], [0], [0], [1], [0, 0, 1, 1], [], []>} : vector<8x8xf32>, vector<8x256xf32>, vector<8x256xf32> -> vector<8x256xf32>
    %213 = arith.addf %206, %212 : vector<8x256xf32>
    %c239_i32_182 = arith.constant 239 : i32
    %214 = tpu.dynamic_rotate %161 by %c239_i32_182 dim 1 : vector<8x256xf32>, i32 -> vector<8x256xf32>
    %215 = vector.broadcast %15 : vector<1x256xf32> to vector<8x256xf32>
    %216 = arith.mulf %214, %215 : vector<8x256xf32>
    %c2_183 = arith.constant 2 : index
    %c8_184 = arith.constant 8 : index
    %c0_185 = arith.constant 0 : index
    %c0_186 = arith.constant 0 : index
    %217 = vector.load %arg3[%c2_183, %c8_184, %c0_185, %c0_186] : memref<6x9x8x8xf32, #tpu.memory_space<vmem>>, vector<1x1x8x8xf32>
    %218 = vector.shape_cast %217 : vector<1x1x8x8xf32> to vector<8x8xf32>
    %cst_187 = arith.constant dense<0.000000e+00> : vector<8x256xf32>
    %219 = tpu.matmul %218, %216, %cst_187 {dimension_numbers = #tpu.dot_dimension_numbers<[1], [0], [0], [1], [0, 0, 1, 1], [], []>} : vector<8x8xf32>, vector<8x256xf32>, vector<8x256xf32> -> vector<8x256xf32>
    %220 = arith.addf %213, %219 : vector<8x256xf32>
    %c2_188 = arith.constant 2 : index
    %c0_189 = arith.constant 0 : index
    %c0_190 = arith.constant 0 : index
    %221 = vector.load %arg4[%c2_188, %c0_189, %c0_190] : memref<6x8x1xf32, #tpu.memory_space<vmem>>, vector<1x8x1xf32>
    %222 = vector.shape_cast %221 : vector<1x8x1xf32> to vector<8x1xf32>
    %223 = vector.broadcast %222 : vector<8x1xf32> to vector<8x256xf32>
    %224 = arith.addf %220, %223 : vector<8x256xf32>
    %cst_191 = arith.constant 0.000000e+00 : f32
    %225 = vector.broadcast %cst_191 : f32 to vector<8x256xf32>
    %226 = arith.maximumf %224, %225 : vector<8x256xf32>
    %c17_i32_192 = arith.constant 17 : i32
    %227 = tpu.dynamic_rotate %226 by %c17_i32_192 dim 1 : vector<8x256xf32>, i32 -> vector<8x256xf32>
    %228 = vector.broadcast %1 : vector<1x256xf32> to vector<8x256xf32>
    %229 = arith.mulf %227, %228 : vector<8x256xf32>
    %c3_193 = arith.constant 3 : index
    %c0_194 = arith.constant 0 : index
    %c0_195 = arith.constant 0 : index
    %c0_196 = arith.constant 0 : index
    %230 = vector.load %arg3[%c3_193, %c0_194, %c0_195, %c0_196] : memref<6x9x8x8xf32, #tpu.memory_space<vmem>>, vector<1x1x8x8xf32>
    %231 = vector.shape_cast %230 : vector<1x1x8x8xf32> to vector<8x8xf32>
    %cst_197 = arith.constant dense<0.000000e+00> : vector<8x256xf32>
    %232 = tpu.matmul %231, %229, %cst_197 {dimension_numbers = #tpu.dot_dimension_numbers<[1], [0], [0], [1], [0, 0, 1, 1], [], []>} : vector<8x8xf32>, vector<8x256xf32>, vector<8x256xf32> -> vector<8x256xf32>
    %c16_i32_198 = arith.constant 16 : i32
    %233 = tpu.dynamic_rotate %226 by %c16_i32_198 dim 1 : vector<8x256xf32>, i32 -> vector<8x256xf32>
    %234 = vector.broadcast %3 : vector<1x256xf32> to vector<8x256xf32>
    %235 = arith.mulf %233, %234 : vector<8x256xf32>
    %c3_199 = arith.constant 3 : index
    %c1_200 = arith.constant 1 : index
    %c0_201 = arith.constant 0 : index
    %c0_202 = arith.constant 0 : index
    %236 = vector.load %arg3[%c3_199, %c1_200, %c0_201, %c0_202] : memref<6x9x8x8xf32, #tpu.memory_space<vmem>>, vector<1x1x8x8xf32>
    %237 = vector.shape_cast %236 : vector<1x1x8x8xf32> to vector<8x8xf32>
    %cst_203 = arith.constant dense<0.000000e+00> : vector<8x256xf32>
    %238 = tpu.matmul %237, %235, %cst_203 {dimension_numbers = #tpu.dot_dimension_numbers<[1], [0], [0], [1], [0, 0, 1, 1], [], []>} : vector<8x8xf32>, vector<8x256xf32>, vector<8x256xf32> -> vector<8x256xf32>
    %239 = arith.addf %232, %238 : vector<8x256xf32>
    %c15_i32_204 = arith.constant 15 : i32
    %240 = tpu.dynamic_rotate %226 by %c15_i32_204 dim 1 : vector<8x256xf32>, i32 -> vector<8x256xf32>
    %241 = vector.broadcast %5 : vector<1x256xf32> to vector<8x256xf32>
    %242 = arith.mulf %240, %241 : vector<8x256xf32>
    %c3_205 = arith.constant 3 : index
    %c2_206 = arith.constant 2 : index
    %c0_207 = arith.constant 0 : index
    %c0_208 = arith.constant 0 : index
    %243 = vector.load %arg3[%c3_205, %c2_206, %c0_207, %c0_208] : memref<6x9x8x8xf32, #tpu.memory_space<vmem>>, vector<1x1x8x8xf32>
    %244 = vector.shape_cast %243 : vector<1x1x8x8xf32> to vector<8x8xf32>
    %cst_209 = arith.constant dense<0.000000e+00> : vector<8x256xf32>
    %245 = tpu.matmul %244, %242, %cst_209 {dimension_numbers = #tpu.dot_dimension_numbers<[1], [0], [0], [1], [0, 0, 1, 1], [], []>} : vector<8x8xf32>, vector<8x256xf32>, vector<8x256xf32> -> vector<8x256xf32>
    %246 = arith.addf %239, %245 : vector<8x256xf32>
    %c1_i32_210 = arith.constant 1 : i32
    %247 = tpu.dynamic_rotate %226 by %c1_i32_210 dim 1 : vector<8x256xf32>, i32 -> vector<8x256xf32>
    %248 = vector.broadcast %7 : vector<1x256xf32> to vector<8x256xf32>
    %249 = arith.mulf %247, %248 : vector<8x256xf32>
    %c3_211 = arith.constant 3 : index
    %c3_212 = arith.constant 3 : index
    %c0_213 = arith.constant 0 : index
    %c0_214 = arith.constant 0 : index
    %250 = vector.load %arg3[%c3_211, %c3_212, %c0_213, %c0_214] : memref<6x9x8x8xf32, #tpu.memory_space<vmem>>, vector<1x1x8x8xf32>
    %251 = vector.shape_cast %250 : vector<1x1x8x8xf32> to vector<8x8xf32>
    %cst_215 = arith.constant dense<0.000000e+00> : vector<8x256xf32>
    %252 = tpu.matmul %251, %249, %cst_215 {dimension_numbers = #tpu.dot_dimension_numbers<[1], [0], [0], [1], [0, 0, 1, 1], [], []>} : vector<8x8xf32>, vector<8x256xf32>, vector<8x256xf32> -> vector<8x256xf32>
    %253 = arith.addf %246, %252 : vector<8x256xf32>
    %c3_216 = arith.constant 3 : index
    %c4_217 = arith.constant 4 : index
    %c0_218 = arith.constant 0 : index
    %c0_219 = arith.constant 0 : index
    %254 = vector.load %arg3[%c3_216, %c4_217, %c0_218, %c0_219] : memref<6x9x8x8xf32, #tpu.memory_space<vmem>>, vector<1x1x8x8xf32>
    %255 = vector.shape_cast %254 : vector<1x1x8x8xf32> to vector<8x8xf32>
    %cst_220 = arith.constant dense<0.000000e+00> : vector<8x256xf32>
    %256 = tpu.matmul %255, %226, %cst_220 {dimension_numbers = #tpu.dot_dimension_numbers<[1], [0], [0], [1], [0, 0, 1, 1], [], []>} : vector<8x8xf32>, vector<8x256xf32>, vector<8x256xf32> -> vector<8x256xf32>
    %257 = arith.addf %253, %256 : vector<8x256xf32>
    %c255_i32_221 = arith.constant 255 : i32
    %258 = tpu.dynamic_rotate %226 by %c255_i32_221 dim 1 : vector<8x256xf32>, i32 -> vector<8x256xf32>
    %259 = vector.broadcast %9 : vector<1x256xf32> to vector<8x256xf32>
    %260 = arith.mulf %258, %259 : vector<8x256xf32>
    %c3_222 = arith.constant 3 : index
    %c5_223 = arith.constant 5 : index
    %c0_224 = arith.constant 0 : index
    %c0_225 = arith.constant 0 : index
    %261 = vector.load %arg3[%c3_222, %c5_223, %c0_224, %c0_225] : memref<6x9x8x8xf32, #tpu.memory_space<vmem>>, vector<1x1x8x8xf32>
    %262 = vector.shape_cast %261 : vector<1x1x8x8xf32> to vector<8x8xf32>
    %cst_226 = arith.constant dense<0.000000e+00> : vector<8x256xf32>
    %263 = tpu.matmul %262, %260, %cst_226 {dimension_numbers = #tpu.dot_dimension_numbers<[1], [0], [0], [1], [0, 0, 1, 1], [], []>} : vector<8x8xf32>, vector<8x256xf32>, vector<8x256xf32> -> vector<8x256xf32>
    %264 = arith.addf %257, %263 : vector<8x256xf32>
    %c241_i32_227 = arith.constant 241 : i32
    %265 = tpu.dynamic_rotate %226 by %c241_i32_227 dim 1 : vector<8x256xf32>, i32 -> vector<8x256xf32>
    %266 = vector.broadcast %11 : vector<1x256xf32> to vector<8x256xf32>
    %267 = arith.mulf %265, %266 : vector<8x256xf32>
    %c3_228 = arith.constant 3 : index
    %c6_229 = arith.constant 6 : index
    %c0_230 = arith.constant 0 : index
    %c0_231 = arith.constant 0 : index
    %268 = vector.load %arg3[%c3_228, %c6_229, %c0_230, %c0_231] : memref<6x9x8x8xf32, #tpu.memory_space<vmem>>, vector<1x1x8x8xf32>
    %269 = vector.shape_cast %268 : vector<1x1x8x8xf32> to vector<8x8xf32>
    %cst_232 = arith.constant dense<0.000000e+00> : vector<8x256xf32>
    %270 = tpu.matmul %269, %267, %cst_232 {dimension_numbers = #tpu.dot_dimension_numbers<[1], [0], [0], [1], [0, 0, 1, 1], [], []>} : vector<8x8xf32>, vector<8x256xf32>, vector<8x256xf32> -> vector<8x256xf32>
    %271 = arith.addf %264, %270 : vector<8x256xf32>
    %c240_i32_233 = arith.constant 240 : i32
    %272 = tpu.dynamic_rotate %226 by %c240_i32_233 dim 1 : vector<8x256xf32>, i32 -> vector<8x256xf32>
    %273 = vector.broadcast %13 : vector<1x256xf32> to vector<8x256xf32>
    %274 = arith.mulf %272, %273 : vector<8x256xf32>
    %c3_234 = arith.constant 3 : index
    %c7_235 = arith.constant 7 : index
    %c0_236 = arith.constant 0 : index
    %c0_237 = arith.constant 0 : index
    %275 = vector.load %arg3[%c3_234, %c7_235, %c0_236, %c0_237] : memref<6x9x8x8xf32, #tpu.memory_space<vmem>>, vector<1x1x8x8xf32>
    %276 = vector.shape_cast %275 : vector<1x1x8x8xf32> to vector<8x8xf32>
    %cst_238 = arith.constant dense<0.000000e+00> : vector<8x256xf32>
    %277 = tpu.matmul %276, %274, %cst_238 {dimension_numbers = #tpu.dot_dimension_numbers<[1], [0], [0], [1], [0, 0, 1, 1], [], []>} : vector<8x8xf32>, vector<8x256xf32>, vector<8x256xf32> -> vector<8x256xf32>
    %278 = arith.addf %271, %277 : vector<8x256xf32>
    %c239_i32_239 = arith.constant 239 : i32
    %279 = tpu.dynamic_rotate %226 by %c239_i32_239 dim 1 : vector<8x256xf32>, i32 -> vector<8x256xf32>
    %280 = vector.broadcast %15 : vector<1x256xf32> to vector<8x256xf32>
    %281 = arith.mulf %279, %280 : vector<8x256xf32>
    %c3_240 = arith.constant 3 : index
    %c8_241 = arith.constant 8 : index
    %c0_242 = arith.constant 0 : index
    %c0_243 = arith.constant 0 : index
    %282 = vector.load %arg3[%c3_240, %c8_241, %c0_242, %c0_243] : memref<6x9x8x8xf32, #tpu.memory_space<vmem>>, vector<1x1x8x8xf32>
    %283 = vector.shape_cast %282 : vector<1x1x8x8xf32> to vector<8x8xf32>
    %cst_244 = arith.constant dense<0.000000e+00> : vector<8x256xf32>
    %284 = tpu.matmul %283, %281, %cst_244 {dimension_numbers = #tpu.dot_dimension_numbers<[1], [0], [0], [1], [0, 0, 1, 1], [], []>} : vector<8x8xf32>, vector<8x256xf32>, vector<8x256xf32> -> vector<8x256xf32>
    %285 = arith.addf %278, %284 : vector<8x256xf32>
    %c3_245 = arith.constant 3 : index
    %c0_246 = arith.constant 0 : index
    %c0_247 = arith.constant 0 : index
    %286 = vector.load %arg4[%c3_245, %c0_246, %c0_247] : memref<6x8x1xf32, #tpu.memory_space<vmem>>, vector<1x8x1xf32>
    %287 = vector.shape_cast %286 : vector<1x8x1xf32> to vector<8x1xf32>
    %288 = vector.broadcast %287 : vector<8x1xf32> to vector<8x256xf32>
    %289 = arith.addf %285, %288 : vector<8x256xf32>
    %290 = arith.addf %289, %161 : vector<8x256xf32>
    %cst_248 = arith.constant 0.000000e+00 : f32
    %291 = vector.broadcast %cst_248 : f32 to vector<8x256xf32>
    %292 = arith.maximumf %290, %291 : vector<8x256xf32>
    %c1_249 = arith.constant 1 : index
    %c0_250 = arith.constant 0 : index
    %c0_251 = arith.constant 0 : index
    %293 = vector.load %arg6[%c1_249, %c0_250, %c0_251] : memref<3x8x1xf32, #tpu.memory_space<vmem>>, vector<1x8x1xf32>
    %294 = vector.shape_cast %293 : vector<1x8x1xf32> to vector<8x1xf32>
    %c2_252 = arith.constant 2 : index
    %c0_253 = arith.constant 0 : index
    %c0_254 = arith.constant 0 : index
    %295 = vector.load %arg5[%c2_252, %c0_253, %c0_254] : memref<9x8x8xf32, #tpu.memory_space<vmem>>, vector<1x8x8xf32>
    %296 = vector.shape_cast %295 : vector<1x8x8xf32> to vector<8x8xf32>
    %cst_255 = arith.constant dense<0.000000e+00> : vector<8x256xf32>
    %297 = tpu.matmul %296, %17, %cst_255 {dimension_numbers = #tpu.dot_dimension_numbers<[1], [0], [0], [1], [0, 0, 1, 1], [], []>} : vector<8x8xf32>, vector<8x256xf32>, vector<8x256xf32> -> vector<8x256xf32>
    %298 = vector.broadcast %294 : vector<8x1xf32> to vector<8x256xf32>
    %299 = arith.addf %298, %297 : vector<8x256xf32>
    %c3_256 = arith.constant 3 : index
    %c0_257 = arith.constant 0 : index
    %c0_258 = arith.constant 0 : index
    %300 = vector.load %arg5[%c3_256, %c0_257, %c0_258] : memref<9x8x8xf32, #tpu.memory_space<vmem>>, vector<1x8x8xf32>
    %301 = vector.shape_cast %300 : vector<1x8x8xf32> to vector<8x8xf32>
    %cst_259 = arith.constant dense<0.000000e+00> : vector<8x256xf32>
    %302 = tpu.matmul %301, %148, %cst_259 {dimension_numbers = #tpu.dot_dimension_numbers<[1], [0], [0], [1], [0, 0, 1, 1], [], []>} : vector<8x8xf32>, vector<8x256xf32>, vector<8x256xf32> -> vector<8x256xf32>
    %303 = arith.addf %299, %302 : vector<8x256xf32>
    %c4_260 = arith.constant 4 : index
    %c0_261 = arith.constant 0 : index
    %c0_262 = arith.constant 0 : index
    %304 = vector.load %arg5[%c4_260, %c0_261, %c0_262] : memref<9x8x8xf32, #tpu.memory_space<vmem>>, vector<1x8x8xf32>
    %305 = vector.shape_cast %304 : vector<1x8x8xf32> to vector<8x8xf32>
    %cst_263 = arith.constant dense<0.000000e+00> : vector<8x256xf32>
    %306 = tpu.matmul %305, %292, %cst_263 {dimension_numbers = #tpu.dot_dimension_numbers<[1], [0], [0], [1], [0, 0, 1, 1], [], []>} : vector<8x8xf32>, vector<8x256xf32>, vector<8x256xf32> -> vector<8x256xf32>
    %307 = arith.addf %303, %306 : vector<8x256xf32>
    %cst_264 = arith.constant 0.000000e+00 : f32
    %308 = vector.broadcast %cst_264 : f32 to vector<8x256xf32>
    %309 = arith.maximumf %307, %308 : vector<8x256xf32>
    %c17_i32_265 = arith.constant 17 : i32
    %310 = tpu.dynamic_rotate %309 by %c17_i32_265 dim 1 : vector<8x256xf32>, i32 -> vector<8x256xf32>
    %311 = vector.broadcast %1 : vector<1x256xf32> to vector<8x256xf32>
    %312 = arith.mulf %310, %311 : vector<8x256xf32>
    %c4_266 = arith.constant 4 : index
    %c0_267 = arith.constant 0 : index
    %c0_268 = arith.constant 0 : index
    %c0_269 = arith.constant 0 : index
    %313 = vector.load %arg3[%c4_266, %c0_267, %c0_268, %c0_269] : memref<6x9x8x8xf32, #tpu.memory_space<vmem>>, vector<1x1x8x8xf32>
    %314 = vector.shape_cast %313 : vector<1x1x8x8xf32> to vector<8x8xf32>
    %cst_270 = arith.constant dense<0.000000e+00> : vector<8x256xf32>
    %315 = tpu.matmul %314, %312, %cst_270 {dimension_numbers = #tpu.dot_dimension_numbers<[1], [0], [0], [1], [0, 0, 1, 1], [], []>} : vector<8x8xf32>, vector<8x256xf32>, vector<8x256xf32> -> vector<8x256xf32>
    %c16_i32_271 = arith.constant 16 : i32
    %316 = tpu.dynamic_rotate %309 by %c16_i32_271 dim 1 : vector<8x256xf32>, i32 -> vector<8x256xf32>
    %317 = vector.broadcast %3 : vector<1x256xf32> to vector<8x256xf32>
    %318 = arith.mulf %316, %317 : vector<8x256xf32>
    %c4_272 = arith.constant 4 : index
    %c1_273 = arith.constant 1 : index
    %c0_274 = arith.constant 0 : index
    %c0_275 = arith.constant 0 : index
    %319 = vector.load %arg3[%c4_272, %c1_273, %c0_274, %c0_275] : memref<6x9x8x8xf32, #tpu.memory_space<vmem>>, vector<1x1x8x8xf32>
    %320 = vector.shape_cast %319 : vector<1x1x8x8xf32> to vector<8x8xf32>
    %cst_276 = arith.constant dense<0.000000e+00> : vector<8x256xf32>
    %321 = tpu.matmul %320, %318, %cst_276 {dimension_numbers = #tpu.dot_dimension_numbers<[1], [0], [0], [1], [0, 0, 1, 1], [], []>} : vector<8x8xf32>, vector<8x256xf32>, vector<8x256xf32> -> vector<8x256xf32>
    %322 = arith.addf %315, %321 : vector<8x256xf32>
    %c15_i32_277 = arith.constant 15 : i32
    %323 = tpu.dynamic_rotate %309 by %c15_i32_277 dim 1 : vector<8x256xf32>, i32 -> vector<8x256xf32>
    %324 = vector.broadcast %5 : vector<1x256xf32> to vector<8x256xf32>
    %325 = arith.mulf %323, %324 : vector<8x256xf32>
    %c4_278 = arith.constant 4 : index
    %c2_279 = arith.constant 2 : index
    %c0_280 = arith.constant 0 : index
    %c0_281 = arith.constant 0 : index
    %326 = vector.load %arg3[%c4_278, %c2_279, %c0_280, %c0_281] : memref<6x9x8x8xf32, #tpu.memory_space<vmem>>, vector<1x1x8x8xf32>
    %327 = vector.shape_cast %326 : vector<1x1x8x8xf32> to vector<8x8xf32>
    %cst_282 = arith.constant dense<0.000000e+00> : vector<8x256xf32>
    %328 = tpu.matmul %327, %325, %cst_282 {dimension_numbers = #tpu.dot_dimension_numbers<[1], [0], [0], [1], [0, 0, 1, 1], [], []>} : vector<8x8xf32>, vector<8x256xf32>, vector<8x256xf32> -> vector<8x256xf32>
    %329 = arith.addf %322, %328 : vector<8x256xf32>
    %c1_i32_283 = arith.constant 1 : i32
    %330 = tpu.dynamic_rotate %309 by %c1_i32_283 dim 1 : vector<8x256xf32>, i32 -> vector<8x256xf32>
    %331 = vector.broadcast %7 : vector<1x256xf32> to vector<8x256xf32>
    %332 = arith.mulf %330, %331 : vector<8x256xf32>
    %c4_284 = arith.constant 4 : index
    %c3_285 = arith.constant 3 : index
    %c0_286 = arith.constant 0 : index
    %c0_287 = arith.constant 0 : index
    %333 = vector.load %arg3[%c4_284, %c3_285, %c0_286, %c0_287] : memref<6x9x8x8xf32, #tpu.memory_space<vmem>>, vector<1x1x8x8xf32>
    %334 = vector.shape_cast %333 : vector<1x1x8x8xf32> to vector<8x8xf32>
    %cst_288 = arith.constant dense<0.000000e+00> : vector<8x256xf32>
    %335 = tpu.matmul %334, %332, %cst_288 {dimension_numbers = #tpu.dot_dimension_numbers<[1], [0], [0], [1], [0, 0, 1, 1], [], []>} : vector<8x8xf32>, vector<8x256xf32>, vector<8x256xf32> -> vector<8x256xf32>
    %336 = arith.addf %329, %335 : vector<8x256xf32>
    %c4_289 = arith.constant 4 : index
    %c4_290 = arith.constant 4 : index
    %c0_291 = arith.constant 0 : index
    %c0_292 = arith.constant 0 : index
    %337 = vector.load %arg3[%c4_289, %c4_290, %c0_291, %c0_292] : memref<6x9x8x8xf32, #tpu.memory_space<vmem>>, vector<1x1x8x8xf32>
    %338 = vector.shape_cast %337 : vector<1x1x8x8xf32> to vector<8x8xf32>
    %cst_293 = arith.constant dense<0.000000e+00> : vector<8x256xf32>
    %339 = tpu.matmul %338, %309, %cst_293 {dimension_numbers = #tpu.dot_dimension_numbers<[1], [0], [0], [1], [0, 0, 1, 1], [], []>} : vector<8x8xf32>, vector<8x256xf32>, vector<8x256xf32> -> vector<8x256xf32>
    %340 = arith.addf %336, %339 : vector<8x256xf32>
    %c255_i32_294 = arith.constant 255 : i32
    %341 = tpu.dynamic_rotate %309 by %c255_i32_294 dim 1 : vector<8x256xf32>, i32 -> vector<8x256xf32>
    %342 = vector.broadcast %9 : vector<1x256xf32> to vector<8x256xf32>
    %343 = arith.mulf %341, %342 : vector<8x256xf32>
    %c4_295 = arith.constant 4 : index
    %c5_296 = arith.constant 5 : index
    %c0_297 = arith.constant 0 : index
    %c0_298 = arith.constant 0 : index
    %344 = vector.load %arg3[%c4_295, %c5_296, %c0_297, %c0_298] : memref<6x9x8x8xf32, #tpu.memory_space<vmem>>, vector<1x1x8x8xf32>
    %345 = vector.shape_cast %344 : vector<1x1x8x8xf32> to vector<8x8xf32>
    %cst_299 = arith.constant dense<0.000000e+00> : vector<8x256xf32>
    %346 = tpu.matmul %345, %343, %cst_299 {dimension_numbers = #tpu.dot_dimension_numbers<[1], [0], [0], [1], [0, 0, 1, 1], [], []>} : vector<8x8xf32>, vector<8x256xf32>, vector<8x256xf32> -> vector<8x256xf32>
    %347 = arith.addf %340, %346 : vector<8x256xf32>
    %c241_i32_300 = arith.constant 241 : i32
    %348 = tpu.dynamic_rotate %309 by %c241_i32_300 dim 1 : vector<8x256xf32>, i32 -> vector<8x256xf32>
    %349 = vector.broadcast %11 : vector<1x256xf32> to vector<8x256xf32>
    %350 = arith.mulf %348, %349 : vector<8x256xf32>
    %c4_301 = arith.constant 4 : index
    %c6_302 = arith.constant 6 : index
    %c0_303 = arith.constant 0 : index
    %c0_304 = arith.constant 0 : index
    %351 = vector.load %arg3[%c4_301, %c6_302, %c0_303, %c0_304] : memref<6x9x8x8xf32, #tpu.memory_space<vmem>>, vector<1x1x8x8xf32>
    %352 = vector.shape_cast %351 : vector<1x1x8x8xf32> to vector<8x8xf32>
    %cst_305 = arith.constant dense<0.000000e+00> : vector<8x256xf32>
    %353 = tpu.matmul %352, %350, %cst_305 {dimension_numbers = #tpu.dot_dimension_numbers<[1], [0], [0], [1], [0, 0, 1, 1], [], []>} : vector<8x8xf32>, vector<8x256xf32>, vector<8x256xf32> -> vector<8x256xf32>
    %354 = arith.addf %347, %353 : vector<8x256xf32>
    %c240_i32_306 = arith.constant 240 : i32
    %355 = tpu.dynamic_rotate %309 by %c240_i32_306 dim 1 : vector<8x256xf32>, i32 -> vector<8x256xf32>
    %356 = vector.broadcast %13 : vector<1x256xf32> to vector<8x256xf32>
    %357 = arith.mulf %355, %356 : vector<8x256xf32>
    %c4_307 = arith.constant 4 : index
    %c7_308 = arith.constant 7 : index
    %c0_309 = arith.constant 0 : index
    %c0_310 = arith.constant 0 : index
    %358 = vector.load %arg3[%c4_307, %c7_308, %c0_309, %c0_310] : memref<6x9x8x8xf32, #tpu.memory_space<vmem>>, vector<1x1x8x8xf32>
    %359 = vector.shape_cast %358 : vector<1x1x8x8xf32> to vector<8x8xf32>
    %cst_311 = arith.constant dense<0.000000e+00> : vector<8x256xf32>
    %360 = tpu.matmul %359, %357, %cst_311 {dimension_numbers = #tpu.dot_dimension_numbers<[1], [0], [0], [1], [0, 0, 1, 1], [], []>} : vector<8x8xf32>, vector<8x256xf32>, vector<8x256xf32> -> vector<8x256xf32>
    %361 = arith.addf %354, %360 : vector<8x256xf32>
    %c239_i32_312 = arith.constant 239 : i32
    %362 = tpu.dynamic_rotate %309 by %c239_i32_312 dim 1 : vector<8x256xf32>, i32 -> vector<8x256xf32>
    %363 = vector.broadcast %15 : vector<1x256xf32> to vector<8x256xf32>
    %364 = arith.mulf %362, %363 : vector<8x256xf32>
    %c4_313 = arith.constant 4 : index
    %c8_314 = arith.constant 8 : index
    %c0_315 = arith.constant 0 : index
    %c0_316 = arith.constant 0 : index
    %365 = vector.load %arg3[%c4_313, %c8_314, %c0_315, %c0_316] : memref<6x9x8x8xf32, #tpu.memory_space<vmem>>, vector<1x1x8x8xf32>
    %366 = vector.shape_cast %365 : vector<1x1x8x8xf32> to vector<8x8xf32>
    %cst_317 = arith.constant dense<0.000000e+00> : vector<8x256xf32>
    %367 = tpu.matmul %366, %364, %cst_317 {dimension_numbers = #tpu.dot_dimension_numbers<[1], [0], [0], [1], [0, 0, 1, 1], [], []>} : vector<8x8xf32>, vector<8x256xf32>, vector<8x256xf32> -> vector<8x256xf32>
    %368 = arith.addf %361, %367 : vector<8x256xf32>
    %c4_318 = arith.constant 4 : index
    %c0_319 = arith.constant 0 : index
    %c0_320 = arith.constant 0 : index
    %369 = vector.load %arg4[%c4_318, %c0_319, %c0_320] : memref<6x8x1xf32, #tpu.memory_space<vmem>>, vector<1x8x1xf32>
    %370 = vector.shape_cast %369 : vector<1x8x1xf32> to vector<8x1xf32>
    %371 = vector.broadcast %370 : vector<8x1xf32> to vector<8x256xf32>
    %372 = arith.addf %368, %371 : vector<8x256xf32>
    %cst_321 = arith.constant 0.000000e+00 : f32
    %373 = vector.broadcast %cst_321 : f32 to vector<8x256xf32>
    %374 = arith.maximumf %372, %373 : vector<8x256xf32>
    %c17_i32_322 = arith.constant 17 : i32
    %375 = tpu.dynamic_rotate %374 by %c17_i32_322 dim 1 : vector<8x256xf32>, i32 -> vector<8x256xf32>
    %376 = vector.broadcast %1 : vector<1x256xf32> to vector<8x256xf32>
    %377 = arith.mulf %375, %376 : vector<8x256xf32>
    %c5_323 = arith.constant 5 : index
    %c0_324 = arith.constant 0 : index
    %c0_325 = arith.constant 0 : index
    %c0_326 = arith.constant 0 : index
    %378 = vector.load %arg3[%c5_323, %c0_324, %c0_325, %c0_326] : memref<6x9x8x8xf32, #tpu.memory_space<vmem>>, vector<1x1x8x8xf32>
    %379 = vector.shape_cast %378 : vector<1x1x8x8xf32> to vector<8x8xf32>
    %cst_327 = arith.constant dense<0.000000e+00> : vector<8x256xf32>
    %380 = tpu.matmul %379, %377, %cst_327 {dimension_numbers = #tpu.dot_dimension_numbers<[1], [0], [0], [1], [0, 0, 1, 1], [], []>} : vector<8x8xf32>, vector<8x256xf32>, vector<8x256xf32> -> vector<8x256xf32>
    %c16_i32_328 = arith.constant 16 : i32
    %381 = tpu.dynamic_rotate %374 by %c16_i32_328 dim 1 : vector<8x256xf32>, i32 -> vector<8x256xf32>
    %382 = vector.broadcast %3 : vector<1x256xf32> to vector<8x256xf32>
    %383 = arith.mulf %381, %382 : vector<8x256xf32>
    %c5_329 = arith.constant 5 : index
    %c1_330 = arith.constant 1 : index
    %c0_331 = arith.constant 0 : index
    %c0_332 = arith.constant 0 : index
    %384 = vector.load %arg3[%c5_329, %c1_330, %c0_331, %c0_332] : memref<6x9x8x8xf32, #tpu.memory_space<vmem>>, vector<1x1x8x8xf32>
    %385 = vector.shape_cast %384 : vector<1x1x8x8xf32> to vector<8x8xf32>
    %cst_333 = arith.constant dense<0.000000e+00> : vector<8x256xf32>
    %386 = tpu.matmul %385, %383, %cst_333 {dimension_numbers = #tpu.dot_dimension_numbers<[1], [0], [0], [1], [0, 0, 1, 1], [], []>} : vector<8x8xf32>, vector<8x256xf32>, vector<8x256xf32> -> vector<8x256xf32>
    %387 = arith.addf %380, %386 : vector<8x256xf32>
    %c15_i32_334 = arith.constant 15 : i32
    %388 = tpu.dynamic_rotate %374 by %c15_i32_334 dim 1 : vector<8x256xf32>, i32 -> vector<8x256xf32>
    %389 = vector.broadcast %5 : vector<1x256xf32> to vector<8x256xf32>
    %390 = arith.mulf %388, %389 : vector<8x256xf32>
    %c5_335 = arith.constant 5 : index
    %c2_336 = arith.constant 2 : index
    %c0_337 = arith.constant 0 : index
    %c0_338 = arith.constant 0 : index
    %391 = vector.load %arg3[%c5_335, %c2_336, %c0_337, %c0_338] : memref<6x9x8x8xf32, #tpu.memory_space<vmem>>, vector<1x1x8x8xf32>
    %392 = vector.shape_cast %391 : vector<1x1x8x8xf32> to vector<8x8xf32>
    %cst_339 = arith.constant dense<0.000000e+00> : vector<8x256xf32>
    %393 = tpu.matmul %392, %390, %cst_339 {dimension_numbers = #tpu.dot_dimension_numbers<[1], [0], [0], [1], [0, 0, 1, 1], [], []>} : vector<8x8xf32>, vector<8x256xf32>, vector<8x256xf32> -> vector<8x256xf32>
    %394 = arith.addf %387, %393 : vector<8x256xf32>
    %c1_i32_340 = arith.constant 1 : i32
    %395 = tpu.dynamic_rotate %374 by %c1_i32_340 dim 1 : vector<8x256xf32>, i32 -> vector<8x256xf32>
    %396 = vector.broadcast %7 : vector<1x256xf32> to vector<8x256xf32>
    %397 = arith.mulf %395, %396 : vector<8x256xf32>
    %c5_341 = arith.constant 5 : index
    %c3_342 = arith.constant 3 : index
    %c0_343 = arith.constant 0 : index
    %c0_344 = arith.constant 0 : index
    %398 = vector.load %arg3[%c5_341, %c3_342, %c0_343, %c0_344] : memref<6x9x8x8xf32, #tpu.memory_space<vmem>>, vector<1x1x8x8xf32>
    %399 = vector.shape_cast %398 : vector<1x1x8x8xf32> to vector<8x8xf32>
    %cst_345 = arith.constant dense<0.000000e+00> : vector<8x256xf32>
    %400 = tpu.matmul %399, %397, %cst_345 {dimension_numbers = #tpu.dot_dimension_numbers<[1], [0], [0], [1], [0, 0, 1, 1], [], []>} : vector<8x8xf32>, vector<8x256xf32>, vector<8x256xf32> -> vector<8x256xf32>
    %401 = arith.addf %394, %400 : vector<8x256xf32>
    %c5_346 = arith.constant 5 : index
    %c4_347 = arith.constant 4 : index
    %c0_348 = arith.constant 0 : index
    %c0_349 = arith.constant 0 : index
    %402 = vector.load %arg3[%c5_346, %c4_347, %c0_348, %c0_349] : memref<6x9x8x8xf32, #tpu.memory_space<vmem>>, vector<1x1x8x8xf32>
    %403 = vector.shape_cast %402 : vector<1x1x8x8xf32> to vector<8x8xf32>
    %cst_350 = arith.constant dense<0.000000e+00> : vector<8x256xf32>
    %404 = tpu.matmul %403, %374, %cst_350 {dimension_numbers = #tpu.dot_dimension_numbers<[1], [0], [0], [1], [0, 0, 1, 1], [], []>} : vector<8x8xf32>, vector<8x256xf32>, vector<8x256xf32> -> vector<8x256xf32>
    %405 = arith.addf %401, %404 : vector<8x256xf32>
    %c255_i32_351 = arith.constant 255 : i32
    %406 = tpu.dynamic_rotate %374 by %c255_i32_351 dim 1 : vector<8x256xf32>, i32 -> vector<8x256xf32>
    %407 = vector.broadcast %9 : vector<1x256xf32> to vector<8x256xf32>
    %408 = arith.mulf %406, %407 : vector<8x256xf32>
    %c5_352 = arith.constant 5 : index
    %c5_353 = arith.constant 5 : index
    %c0_354 = arith.constant 0 : index
    %c0_355 = arith.constant 0 : index
    %409 = vector.load %arg3[%c5_352, %c5_353, %c0_354, %c0_355] : memref<6x9x8x8xf32, #tpu.memory_space<vmem>>, vector<1x1x8x8xf32>
    %410 = vector.shape_cast %409 : vector<1x1x8x8xf32> to vector<8x8xf32>
    %cst_356 = arith.constant dense<0.000000e+00> : vector<8x256xf32>
    %411 = tpu.matmul %410, %408, %cst_356 {dimension_numbers = #tpu.dot_dimension_numbers<[1], [0], [0], [1], [0, 0, 1, 1], [], []>} : vector<8x8xf32>, vector<8x256xf32>, vector<8x256xf32> -> vector<8x256xf32>
    %412 = arith.addf %405, %411 : vector<8x256xf32>
    %c241_i32_357 = arith.constant 241 : i32
    %413 = tpu.dynamic_rotate %374 by %c241_i32_357 dim 1 : vector<8x256xf32>, i32 -> vector<8x256xf32>
    %414 = vector.broadcast %11 : vector<1x256xf32> to vector<8x256xf32>
    %415 = arith.mulf %413, %414 : vector<8x256xf32>
    %c5_358 = arith.constant 5 : index
    %c6_359 = arith.constant 6 : index
    %c0_360 = arith.constant 0 : index
    %c0_361 = arith.constant 0 : index
    %416 = vector.load %arg3[%c5_358, %c6_359, %c0_360, %c0_361] : memref<6x9x8x8xf32, #tpu.memory_space<vmem>>, vector<1x1x8x8xf32>
    %417 = vector.shape_cast %416 : vector<1x1x8x8xf32> to vector<8x8xf32>
    %cst_362 = arith.constant dense<0.000000e+00> : vector<8x256xf32>
    %418 = tpu.matmul %417, %415, %cst_362 {dimension_numbers = #tpu.dot_dimension_numbers<[1], [0], [0], [1], [0, 0, 1, 1], [], []>} : vector<8x8xf32>, vector<8x256xf32>, vector<8x256xf32> -> vector<8x256xf32>
    %419 = arith.addf %412, %418 : vector<8x256xf32>
    %c240_i32_363 = arith.constant 240 : i32
    %420 = tpu.dynamic_rotate %374 by %c240_i32_363 dim 1 : vector<8x256xf32>, i32 -> vector<8x256xf32>
    %421 = vector.broadcast %13 : vector<1x256xf32> to vector<8x256xf32>
    %422 = arith.mulf %420, %421 : vector<8x256xf32>
    %c5_364 = arith.constant 5 : index
    %c7_365 = arith.constant 7 : index
    %c0_366 = arith.constant 0 : index
    %c0_367 = arith.constant 0 : index
    %423 = vector.load %arg3[%c5_364, %c7_365, %c0_366, %c0_367] : memref<6x9x8x8xf32, #tpu.memory_space<vmem>>, vector<1x1x8x8xf32>
    %424 = vector.shape_cast %423 : vector<1x1x8x8xf32> to vector<8x8xf32>
    %cst_368 = arith.constant dense<0.000000e+00> : vector<8x256xf32>
    %425 = tpu.matmul %424, %422, %cst_368 {dimension_numbers = #tpu.dot_dimension_numbers<[1], [0], [0], [1], [0, 0, 1, 1], [], []>} : vector<8x8xf32>, vector<8x256xf32>, vector<8x256xf32> -> vector<8x256xf32>
    %426 = arith.addf %419, %425 : vector<8x256xf32>
    %c239_i32_369 = arith.constant 239 : i32
    %427 = tpu.dynamic_rotate %374 by %c239_i32_369 dim 1 : vector<8x256xf32>, i32 -> vector<8x256xf32>
    %428 = vector.broadcast %15 : vector<1x256xf32> to vector<8x256xf32>
    %429 = arith.mulf %427, %428 : vector<8x256xf32>
    %c5_370 = arith.constant 5 : index
    %c8_371 = arith.constant 8 : index
    %c0_372 = arith.constant 0 : index
    %c0_373 = arith.constant 0 : index
    %430 = vector.load %arg3[%c5_370, %c8_371, %c0_372, %c0_373] : memref<6x9x8x8xf32, #tpu.memory_space<vmem>>, vector<1x1x8x8xf32>
    %431 = vector.shape_cast %430 : vector<1x1x8x8xf32> to vector<8x8xf32>
    %cst_374 = arith.constant dense<0.000000e+00> : vector<8x256xf32>
    %432 = tpu.matmul %431, %429, %cst_374 {dimension_numbers = #tpu.dot_dimension_numbers<[1], [0], [0], [1], [0, 0, 1, 1], [], []>} : vector<8x8xf32>, vector<8x256xf32>, vector<8x256xf32> -> vector<8x256xf32>
    %433 = arith.addf %426, %432 : vector<8x256xf32>
    %c5_375 = arith.constant 5 : index
    %c0_376 = arith.constant 0 : index
    %c0_377 = arith.constant 0 : index
    %434 = vector.load %arg4[%c5_375, %c0_376, %c0_377] : memref<6x8x1xf32, #tpu.memory_space<vmem>>, vector<1x8x1xf32>
    %435 = vector.shape_cast %434 : vector<1x8x1xf32> to vector<8x1xf32>
    %436 = vector.broadcast %435 : vector<8x1xf32> to vector<8x256xf32>
    %437 = arith.addf %433, %436 : vector<8x256xf32>
    %438 = arith.addf %437, %309 : vector<8x256xf32>
    %cst_378 = arith.constant 0.000000e+00 : f32
    %439 = vector.broadcast %cst_378 : f32 to vector<8x256xf32>
    %440 = arith.maximumf %438, %439 : vector<8x256xf32>
    %c2_379 = arith.constant 2 : index
    %c0_380 = arith.constant 0 : index
    %c0_381 = arith.constant 0 : index
    %441 = vector.load %arg6[%c2_379, %c0_380, %c0_381] : memref<3x8x1xf32, #tpu.memory_space<vmem>>, vector<1x8x1xf32>
    %442 = vector.shape_cast %441 : vector<1x8x1xf32> to vector<8x1xf32>
    %c5_382 = arith.constant 5 : index
    %c0_383 = arith.constant 0 : index
    %c0_384 = arith.constant 0 : index
    %443 = vector.load %arg5[%c5_382, %c0_383, %c0_384] : memref<9x8x8xf32, #tpu.memory_space<vmem>>, vector<1x8x8xf32>
    %444 = vector.shape_cast %443 : vector<1x8x8xf32> to vector<8x8xf32>
    %cst_385 = arith.constant dense<0.000000e+00> : vector<8x256xf32>
    %445 = tpu.matmul %444, %17, %cst_385 {dimension_numbers = #tpu.dot_dimension_numbers<[1], [0], [0], [1], [0, 0, 1, 1], [], []>} : vector<8x8xf32>, vector<8x256xf32>, vector<8x256xf32> -> vector<8x256xf32>
    %446 = vector.broadcast %442 : vector<8x1xf32> to vector<8x256xf32>
    %447 = arith.addf %446, %445 : vector<8x256xf32>
    %c6_386 = arith.constant 6 : index
    %c0_387 = arith.constant 0 : index
    %c0_388 = arith.constant 0 : index
    %448 = vector.load %arg5[%c6_386, %c0_387, %c0_388] : memref<9x8x8xf32, #tpu.memory_space<vmem>>, vector<1x8x8xf32>
    %449 = vector.shape_cast %448 : vector<1x8x8xf32> to vector<8x8xf32>
    %cst_389 = arith.constant dense<0.000000e+00> : vector<8x256xf32>
    %450 = tpu.matmul %449, %148, %cst_389 {dimension_numbers = #tpu.dot_dimension_numbers<[1], [0], [0], [1], [0, 0, 1, 1], [], []>} : vector<8x8xf32>, vector<8x256xf32>, vector<8x256xf32> -> vector<8x256xf32>
    %451 = arith.addf %447, %450 : vector<8x256xf32>
    %c7_390 = arith.constant 7 : index
    %c0_391 = arith.constant 0 : index
    %c0_392 = arith.constant 0 : index
    %452 = vector.load %arg5[%c7_390, %c0_391, %c0_392] : memref<9x8x8xf32, #tpu.memory_space<vmem>>, vector<1x8x8xf32>
    %453 = vector.shape_cast %452 : vector<1x8x8xf32> to vector<8x8xf32>
    %cst_393 = arith.constant dense<0.000000e+00> : vector<8x256xf32>
    %454 = tpu.matmul %453, %292, %cst_393 {dimension_numbers = #tpu.dot_dimension_numbers<[1], [0], [0], [1], [0, 0, 1, 1], [], []>} : vector<8x8xf32>, vector<8x256xf32>, vector<8x256xf32> -> vector<8x256xf32>
    %455 = arith.addf %451, %454 : vector<8x256xf32>
    %c8_394 = arith.constant 8 : index
    %c0_395 = arith.constant 0 : index
    %c0_396 = arith.constant 0 : index
    %456 = vector.load %arg5[%c8_394, %c0_395, %c0_396] : memref<9x8x8xf32, #tpu.memory_space<vmem>>, vector<1x8x8xf32>
    %457 = vector.shape_cast %456 : vector<1x8x8xf32> to vector<8x8xf32>
    %cst_397 = arith.constant dense<0.000000e+00> : vector<8x256xf32>
    %458 = tpu.matmul %457, %440, %cst_397 {dimension_numbers = #tpu.dot_dimension_numbers<[1], [0], [0], [1], [0, 0, 1, 1], [], []>} : vector<8x8xf32>, vector<8x256xf32>, vector<8x256xf32> -> vector<8x256xf32>
    %459 = arith.addf %455, %458 : vector<8x256xf32>
    %cst_398 = arith.constant 0.000000e+00 : f32
    %460 = vector.broadcast %cst_398 : f32 to vector<8x256xf32>
    %461 = arith.maximumf %459, %460 : vector<8x256xf32>
    %c0_399 = arith.constant 0 : index
    %c0_400 = arith.constant 0 : index
    %c0_401 = arith.constant 0 : index
    %462 = vector.load %arg7[%c0_399, %c0_400, %c0_401] : memref<1x8x256xf32, #tpu.memory_space<vmem>>, vector<1x8x256xf32>
    %463 = vector.shape_cast %462 : vector<1x8x256xf32> to vector<8x256xf32>
    %464 = vector.shape_cast %461 : vector<8x256xf32> to vector<1x8x256xf32>
    tpu.vector_store %arg7[%c0_399, %c0_400, %c0_401], %464 {strides = array<i32>} : memref<1x8x256xf32, #tpu.memory_space<vmem>>, vector<1x8x256xf32>,
    return
  }
  func.func @transform_0(%arg0: i32) -> (i32, i32, i32) {
    %c0_i32 = arith.constant 0 : i32
    %c0_i32_0 = arith.constant 0 : i32
    %c0_i32_1 = arith.constant 0 : i32
    return %arg0, %c0_i32, %c0_i32_0 : i32, i32, i32
  }
  func.func @transform_1(%arg0: i32) -> (i32, i32, i32) {
    %c0_i32 = arith.constant 0 : i32
    %c0_i32_0 = arith.constant 0 : i32
    %c0_i32_1 = arith.constant 0 : i32
    %c0_i32_2 = arith.constant 0 : i32
    return %c0_i32, %c0_i32_0, %c0_i32_1 : i32, i32, i32
  }
  func.func @transform_2(%arg0: i32) -> (i32, i32, i32, i32) {
    %c0_i32 = arith.constant 0 : i32
    %c0_i32_0 = arith.constant 0 : i32
    %c0_i32_1 = arith.constant 0 : i32
    %c0_i32_2 = arith.constant 0 : i32
    %c0_i32_3 = arith.constant 0 : i32
    return %c0_i32, %c0_i32_0, %c0_i32_1, %c0_i32_2 : i32, i32, i32, i32
  }
  func.func @transform_3(%arg0: i32) -> (i32, i32, i32) {
    %c0_i32 = arith.constant 0 : i32
    %c0_i32_0 = arith.constant 0 : i32
    %c0_i32_1 = arith.constant 0 : i32
    %c0_i32_2 = arith.constant 0 : i32
    return %c0_i32, %c0_i32_0, %c0_i32_1 : i32, i32, i32
  }
  func.func @transform_4(%arg0: i32) -> (i32, i32, i32) {
    %c0_i32 = arith.constant 0 : i32
    %c0_i32_0 = arith.constant 0 : i32
    %c0_i32_1 = arith.constant 0 : i32
    %c0_i32_2 = arith.constant 0 : i32
    return %c0_i32, %c0_i32_0, %c0_i32_1 : i32, i32, i32
  }
  func.func @transform_5(%arg0: i32) -> (i32, i32, i32) {
    %c0_i32 = arith.constant 0 : i32
    %c0_i32_0 = arith.constant 0 : i32
    %c0_i32_1 = arith.constant 0 : i32
    %c0_i32_2 = arith.constant 0 : i32
    return %c0_i32, %c0_i32_0, %c0_i32_1 : i32, i32, i32
  }
  func.func @transform_6(%arg0: i32) -> (i32, i32, i32) {
    %c0_i32 = arith.constant 0 : i32
    %c0_i32_0 = arith.constant 0 : i32
    %c0_i32_1 = arith.constant 0 : i32
    return %arg0, %c0_i32, %c0_i32_0 : i32, i32, i32
  }
}

</mosaic_0001>

<bundles_post_ra>
// kernel: carn_forward.1
= control target key start
LH: loop header
LB: loop body
LE: loop exit
PB: predicated region body
PF: predicated region fallthrough
CT: control target
= control target key end

     0   :  { %s6134_s21 = smov 0   ;;  %s7131_s0 = inlined_call_operand.vmem [shape: f32[2,8,256], index: 0, kind: input, shape index: {}]   ;;  %s7132_s1 = inlined_call_operand.vmem [shape: f32[9,1,256], index: 1, kind: input, shape index: {}]   ;;  %s7133_s2 = inlined_call_operand.vmem [shape: f32[6,9,8,8], index: 2, kind: input, shape index: {}]   ;;  %s7134_s3 = inlined_call_operand.vmem [shape: f32[6,8,1], index: 3, kind: input, shape index: {}]   ;;  %s7135_s4 = inlined_call_operand.vmem [shape: f32[9,8,8], index: 4, kind: input, shape index: {}]   ;;  %s7136_s5 = inlined_call_operand.vmem [shape: f32[3,8,1], index: 5, kind: input, shape index: {}]   ;;  %s7137_s6 = inlined_call_operand.vmem [shape: f32[2,8,256], index: 6, kind: output, shape index: {}]  }
   0x1 LB: > { %s5794_s22 = sadd.s32 4294967295, %s6087_s21   ;;  %p5798_p0 = scmp.ge.s32.totalorder %s6087_s21, 1  ;;  %s6087_s21 = sphi %s6134_s21, %s16_s21  }
   0x2   : > { %p212_p1 = scmp.lt.s32.totalorder %s6087_s21, 3 }
   0x4   : > { %p213_p2 = pnand %p5798_p0, %p212_p1 }
   0x5   : > { %p242_p3 = scmp.lt.s32.totalorder (!%p213_p2), %s5794_s22, 1  ;;  %v6089_v0 = vmov (!%p213_p2), 0.0   ;;  %s6090_s27 = smov (!%p213_p2), 17   ;;  %v1129_v3 = vld [vmem:[%s7134_s3] sm:$0xff] (!%p213_p2)  ;;  %v6098_v4 = vmov (!%p213_p2), 0   ;;  %v273_v5 = vlaneseq (!%p213_p2)  ;;  %vm314_vm3 = vcmask (!%p213_p2), 64512  }
   0x6   : > { %216 = sbr.rel (%p213_p2) target bundleno = 3088 (0xc10), region = 44  ;;  %456 = vmatprep.mubr.f32.mxu0 (!%p213_p2), %v6089_v0  ;;  %382 = vmatprep.mubr.f32.mxu1 (!%p213_p2), %v6089_v0  ;;  %s6091_s28 = smov (!%p213_p2), 15   ;;  %v5804_v10 = vld [vmem:[%s7132_s1 + $0x4] sm:$0x3] (!%p213_p2)  ;;  %v252_v11 = vld [vmem:[%s7132_s1] sm:$0x3] (!%p213_p2) }
   0x7   : > { %s6092_s29 = smov (!%p213_p2), 1   ;;  %s6093_s30 = smov (!%p213_p2), 127   ;;  %6077 = vset.pattern.permute.xlu0 (!%p213_p2), %v6098_v4  ;;  %6078 = vset.pattern.permute.xlu1 (!%p213_p2), %v6098_v4  ;;  %v280_v6 = vshrl.u32 (!%p213_p2), %v273_v5, 7  ;;  %v6195_v7 = vand.u32 (!%p213_p2), 127, %v273_v5  ;;  %v5805_v18 = vld [vmem:[%s7132_s1 + $0x6] sm:$0x3] (!%p213_p2) }
   0x8   : > { %s6094_s7 = smov (!%p213_p2), 113   ;;  %s6095_s8 = smov (!%p213_p2), 112   ;;  %v291_v30 = vld [vmem:[%s7133_s2] sm:$0xff] (!%p213_p2)  ;;  %v5813_v39 = vld [vmem:[%s7133_s2 + $0x10] sm:$0xff] (!%p213_p2)  ;;  %v5806_v43 = vld [vmem:[%s7132_s1 + $0xa] sm:$0x3] (!%p213_p2) }
   0x9   : > { %s6096_s9 = smov (!%p213_p2), 16   ;;  %s6097_s10 = smov (!%p213_p2), 111   ;;  %v6197_v8 = vsub.s32 (!%p213_p2), 0, %v280_v6  ;;  %v6199_v9 = vsub.s32 (!%p213_p2), 1, %v280_v6  ;;  %vm467_vm0 = vcmp.lt.s32.totalorder (!%p213_p2), %v6195_v7, 15  ;;  %vm275_vm1 = vcmp.lt.s32.totalorder (!%p213_p2), %v6195_v7, 17 }
   0xa   : > { %vm565_vm2 = vcmp.lt.s32.totalorder (!%p213_p2), %v6195_v7, 1  ;;  %vm741_vm4 = vcmp.lt.s32.totalorder (!%p213_p2), %v6195_v7, 127  ;;  %v5803_v44 = vld [vmem:[%s7132_s1 + $0x2] sm:$0x3] (!%p213_p2)  ;;  %vm296_vm5 = vcmp.lt.s32.totalorder (!%p213_p2), %v6195_v7, 16  ;;  %v5815_v51 = vld [vmem:[%s7133_s2 + $0x18] sm:$0xff] (!%p213_p2) }
   0xb   : > { %v6210_v14 = vrot.slane (!%p213_p2), %v252_v11, %v6199_v9  ;;  %v6213_v15 = vrot.slane (!%p213_p2), %v252_v11, %v6197_v8  ;;  %v6216_v16 = vrot.slane (!%p213_p2), %v5804_v10, %v6199_v9  ;;  %v6219_v17 = vrot.slane (!%p213_p2), %v5804_v10, %v6197_v8  ;;  %v5807_v55 = vld [vmem:[%s7132_s1 + $0xc] sm:$0x3] (!%p213_p2)  ;;  %v5817_v4 = vld [vmem:[%s7133_s2 + $0x20] sm:$0xff] (!%p213_p2)  ;;  %v5808_v10 = vld [vmem:[%s7132_s1 + $0xe] sm:$0x3] (!%p213_p2) }
   0xc   : > { %v6237_v28 = vrot.slane (!%p213_p2), %v5805_v18, %v6199_v9  ;;  %v6249_v35 = vrot.slane (!%p213_p2), %v5805_v18, %v6197_v8  ;;  %v6268_v45 = vrot.slane (!%p213_p2), %v5806_v43, %v6199_v9  ;;  %v6274_v49 = vrot.slane (!%p213_p2), %v5803_v44, %v6199_v9  ;;  %v5810_v61 = vld [vmem:[%s7133_s2 + $0x8] sm:$0xff] (!%p213_p2) }
   0xd   : > { %s7139_s22 = smov (!%p242_p3, %s5794_s22), 1  ;;  %v6277_v50 = vrot.slane %v5803_v44, %v6197_v8  ;;  %vm839_vm6 = vcmp.lt.s32.totalorder %v6195_v7, 113  ;;  %v6297_v60 = vrot.slane %v5806_v43, %v6197_v8  ;;  %v6305_v63 = vrot.slane %v5807_v55, %v6199_v9 }
   0xe   : > { %s5943_s23 = sshll.u32 %s7139_s22, 4  ;;  %vm937_vm7 = vcmp.lt.s32.totalorder %v6195_v7, 112  ;;  %v6323_v11 = vrot.slane %v5807_v55, %v6197_v8  ;;  %vm1035_vm8 = vcmp.lt.s32.totalorder %v6195_v7, 111  ;;  %v5937_v7 = vld [vmem:[%s7135_s4 + $0x38] sm:$0xff] }
   0xf   : > { %s6152_s26 = scalar_lea.vmem %s7131_s0, %s5943_s23 }
  0x10   : > { %v6155_v1 = vld [vmem:[%s6152_s26] sm:$0xff]  ;;  %v6162_v2 = vld [vmem:[%s6152_s26 + $0x8] sm:$0xff] }
  0x11   : > { %269 = vrot.lane.b32.xlu0 %v6155_v1, %s6090_s27  ;;  %463 = vrot.lane.b32.xlu1 %v6155_v1, %s6091_s28 }
  0x15   : > { %271 = vrot.lane.b32.xlu0 %v6162_v2, %s6090_s27  ;;  %465 = vrot.lane.b32.xlu1 %v6162_v2, %s6091_s28 }
  0x19   : > { %563 = vrot.lane.b32.xlu1 %v6162_v2, %s6092_s29  ;;  %561 = vrot.lane.b32.xlu0 %v6155_v1, %s6092_s29 }
  0x1d   : > { %739 = vrot.lane.b32.xlu1 %v6162_v2, %s6093_s30  ;;  %737 = vrot.lane.b32.xlu0 %v6155_v1, %s6093_s30 }
  0x21   : > { %837 = vrot.lane.b32.xlu1 %v6162_v2, %s6094_s7  ;;  %835 = vrot.lane.b32.xlu0 %v6155_v1, %s6094_s7 }
  0x25   : > { %935 = vrot.lane.b32.xlu1 %v6162_v2, %s6095_s8  ;;  %933 = vrot.lane.b32.xlu0 %v6155_v1, %s6095_s8 }
  0x29   : > { %294 = vrot.lane.b32.xlu1 %v6162_v2, %s6096_s9  ;;  %292 = vrot.lane.b32.xlu0 %v6155_v1, %s6096_s9 }
  0x2d   : > { %1033 = vrot.lane.b32.xlu1 %v6162_v2, %s6097_s10  ;;  %1031 = vrot.lane.b32.xlu0 %v6155_v1, %s6097_s10 }
  0x31   : > { %1132 = vperm.xlu0 %6077, %v1129_v3  }
  0x83   : > { %v270_v12 = vpop.permute.xlu0 %269  ;;  %v464_v13 = vpop.permute.xlu1 %463 }
  0x87   : > { %v272_v19 = vpop.permute.xlu0 %271  ;;  %v466_v20 = vpop.permute.xlu1 %465 }
  0x88   : > { %v468_v21 = vsel %vm467_vm0, %v464_v13, %v466_v20  ;;  %v469_v22 = vsel %vm467_vm0, %v466_v20, %v464_v13  ;;  %v276_v23 = vsel %vm275_vm1, %v270_v12, %v272_v19  ;;  %v277_v24 = vsel %vm275_vm1, %v272_v19, %v270_v12  ;;  %v5819_v19 = vld [vmem:[%s7133_s2 + $0x28] sm:$0xff] }
  0x89   : > { %v290_v25 = vmul.f32 %v6210_v14, %v276_v23  ;;  %v289_v26 = vmul.f32 %v6213_v15, %v277_v24  ;;  %v482_v27 = vmul.f32 %v6216_v16, %v468_v21  ;;  %v481_v29 = vmul.f32 %v6219_v17, %v469_v22  ;;  %v5809_v22 = vld [vmem:[%s7132_s1 + $0x10] sm:$0x3] }
  0x8a   : > { %v6328_v13 = vrot.slane %v5808_v10, %v6199_v9 }
  0x8b   : > { %392 = vmatprep.subr.mxu0 %v290_v25  ;;  %v564_v31 = vpop.permute.xlu1 %563  ;;  %v562_v32 = vpop.permute.xlu0 %561  ;;  %v6344_v25 = vrot.slane %v5808_v10, %v6197_v8 }
  0x8c   : > { %393 = vmatpush1.msra.mxu0 %v289_v26  ;;  %v566_v33 = vsel %vm565_vm2, %v562_v32, %v564_v31  ;;  %v567_v36 = vsel %vm565_vm2, %v564_v31, %v562_v32 }
  0x8d   : > { %5812 = vmatmul.mubr.msk.f32.vlgmr.msra.gmra.mrb[0].mxu0 %vm314_vm3, %v291_v30  ;;  %488 = vmatprep.subr.mxu0 %v482_v27  ;;  %v580_v34 = vmul.f32 %v6237_v28, %v566_v33  ;;  %v579_v40 = vmul.f32 %v6249_v35, %v567_v36  ;;  %v6349_v27 = vrot.slane %v5809_v22, %v6199_v9  ;;  %v5821_v30 = vld [vmem:[%s7133_s2 + $0x30] sm:$0xff] }
  0x8e   : > { %489 = vmatpush1.msra.mxu0 %v481_v29  ;;  %552 = vmatprep.mubr.f32.mxu0 %v6089_v0  ;;  %v6361_v33 = vrot.slane %v5809_v22, %v6197_v8  ;;  %v5825_v8 = vld [vmem:[%s7133_s2 + $0x40] sm:$0xff] }
  0x8f   : > { %586 = vmatprep.subr.mxu0 %v580_v34  ;;  %v740_v37 = vpop.permute.xlu1 %739  ;;  %v738_v38 = vpop.permute.xlu0 %737  ;;  %v5823_v34 = vld [vmem:[%s7133_s2 + $0x38] sm:$0xff] }
  0x90   : > { %v743_v48 = vsel %vm741_vm4, %v740_v37, %v738_v38  ;;  %v742_v62 = vsel %vm741_vm4, %v738_v38, %v740_v37 }
  0x91   : > { %v756_v52 = vmul.f32 %v6268_v45, %v743_v48  ;;  %v755_v5 = vmul.f32 %v6297_v60, %v742_v62 }
  0x93   : > { %v838_v41 = vpop.permute.xlu1 %837  ;;  %v836_v42 = vpop.permute.xlu0 %835 }
  0x94   : > { %v841_v3 = vsel %vm839_vm6, %v838_v41, %v836_v42  ;;  %v840_v12 = vsel %vm839_vm6, %v836_v42, %v838_v41 }
  0x95   : > { %5814 = vmatmul.mubr.msk.f32.vlgmr.msra.gmra.mrb[0].mxu0 %vm314_vm3, %v5813_v39  ;;  %v854_v6 = vmul.f32 %v6305_v63, %v841_v3  ;;  %v853_v20 = vmul.f32 %v6323_v11, %v840_v12 }
  0x96   : > { %587 = vmatpush1.msra.mxu0 %v579_v40  ;;  %650 = vmatprep.mubr.f32.mxu0 %v6089_v0 }
  0x97   : > { %664 = vmatprep.subr.mxu0 %v6162_v2  ;;  %v936_v46 = vpop.permute.xlu1 %935  ;;  %v934_v47 = vpop.permute.xlu0 %933 }
  0x98   : > { %v939_v18 = vsel %vm937_vm7, %v936_v46, %v934_v47  ;;  %v938_v26 = vsel %vm937_vm7, %v934_v47, %v936_v46 }
  0x99   : > { %v952_v21 = vmul.f32 %v6328_v13, %v939_v18  ;;  %v951_v31 = vmul.f32 %v6344_v25, %v938_v26 }
  0x9b   : > { %v295_v53 = vpop.permute.xlu1 %294  ;;  %v293_v54 = vpop.permute.xlu0 %292 }
  0x9c   : > { %v298_v56 = vsel %vm296_vm5, %v295_v53, %v293_v54  ;;  %v297_v57 = vsel %vm296_vm5, %v293_v54, %v295_v53 }
  0x9d   : > { %5816 = vmatmul.mubr.msk.f32.vlgmr.msra.gmra.mrb[0].mxu0 %vm314_vm3, %v5815_v51  ;;  %v311_v58 = vmul.f32 %v6274_v49, %v297_v57  ;;  %v310_v59 = vmul.f32 %v6277_v50, %v298_v56  ;;  %v5845_v51 = vld [vmem:[%s7134_s3 + $0x8] sm:$0xff] }
  0x9e   : > { %665 = vmatpush1.msra.mxu0 %v6155_v1  ;;  %728 = vmatprep.mubr.f32.mxu0 %v6089_v0 }
  0x9f   : > { %762 = vmatprep.subr.mxu0 %v756_v52  ;;  %318 = vmatprep.subr.mxu1 %v311_v58  ;;  %v1034_v23 = vpop.permute.xlu1 %1033  ;;  %v1032_v24 = vpop.permute.xlu0 %1031 }
  0xa0   : > { %319 = vmatpush1.msra.mxu1 %v310_v59  ;;  %v1037_v29 = vsel %vm1035_vm8, %v1034_v23, %v1032_v24  ;;  %v1036_v9 = vsel %vm1035_vm8, %v1032_v24, %v1034_v23  ;;  %v5828_v59 = vld [vmem:[%s7133_s2 + $0x50] sm:$0xff] }
  0xa1   : > { %5811 = vmatmul.mubr.msk.f32.vlgmr.msra.gmra.mrb[0].mxu1 %vm314_vm3, %v5810_v61  ;;  %v1050_v32 = vmul.f32 %v6349_v27, %v1037_v29  ;;  %v1049_v36 = vmul.f32 %v6361_v33, %v1036_v9 }
  0xa2   : > { %1226 = vmatprep.mubr.f32.mxu1 %v6089_v0 }
  0xa5   : > { %5818 = vmatmul.mubr.msk.f32.vlgmr.msra.gmra.mrb[0].mxu0 %vm314_vm3, %v5817_v4 }
  0xa6   : > { %763 = vmatpush1.msra.mxu0 %v755_v5  ;;  %826 = vmatprep.mubr.f32.mxu0 %v6089_v0 }
  0xa7   : > { %860 = vmatprep.subr.mxu0 %v854_v6 }
  0xad   : > { %5820 = vmatmul.mubr.msk.f32.vlgmr.msra.gmra.mrb[0].mxu0 %vm314_vm3, %v5819_v19 }
  0xae   : > { %861 = vmatpush1.msra.mxu0 %v853_v20  ;;  %924 = vmatprep.mubr.f32.mxu0 %v6089_v0  ;;  %v5827_v20 = vld [vmem:[%s7133_s2 + $0x48] sm:$0xff] }
  0xaf   : > { %958 = vmatprep.subr.mxu0 %v952_v21 }
  0xb0   : > { %v1133_v40 = vpop.permute.xlu0 %1132 }
  0xb5   : > { %5822 = vmatmul.mubr.msk.f32.vlgmr.msra.gmra.mrb[0].mxu0 %vm314_vm3, %v5821_v30  ;;  %v5831_v30 = vld [vmem:[%s7133_s2 + $0x58] sm:$0xff] }
  0xb6   : > { %959 = vmatpush1.msra.mxu0 %v951_v31  ;;  %1022 = vmatprep.mubr.f32.mxu0 %v6089_v0 }
  0xb7   : > { %1056 = vmatprep.subr.mxu0 %v1050_v32 }
  0xbd   : > { %5824 = vmatmul.mubr.msk.f32.vlgmr.msra.gmra.mrb[0].mxu0 %vm314_vm3, %v5823_v34 }
  0xbe   : > { %1057 = vmatpush1.msra.mxu0 %v1049_v36  ;;  %1120 = vmatprep.mubr.f32.mxu0 %v6089_v0  ;;  %v5833_v36 = vld [vmem:[%s7133_s2 + $0x60] sm:$0xff] }
  0xbf   : > { %1919 = vmatprep.subr.mxu0 %v6162_v2 }
  0xc5   : > { %5826 = vmatmul.mubr.msk.f32.vlgmr.msra.gmra.mrb[0].mxu0 %vm314_vm3, %v5825_v8 }
  0xc6   : > { %1920 = vmatpush1.msra.mxu0 %v6155_v1  ;;  %1983 = vmatprep.mubr.f32.mxu0 %v6089_v0 }
 0x174   : > { %v384_v37 = vpop.f32.mrb[0].mxu1 }
 0x175   : > { %v386_v38 = vpop.f32.mrb[1].mxu1 }
 0x198   : > { %v1122_v39 = vpop.f32.mrb[0].mxu0 }
 0x199   : > { %v5945_v41 = vadd.f32 %v1122_v39, %v384_v37  ;;  %v1124_v42 = vpop.f32.mrb[1].mxu0 }
 0x19a   : > { %v5946_v43 = vadd.f32 %v1124_v42, %v386_v38 }
 0x19b   : > { %v1135_v44 = vadd.f32 %v5945_v41, %v1133_v40  ;;  %v5835_v41 = vld [vmem:[%s7133_s2 + $0x68] sm:$0xff] }
 0x19c   : > { %v1136_v46 = vadd.f32 %v5946_v43, %v1133_v40 }
 0x19d   : > { %v6378_v47 = vmax.f32 %v1135_v44, 0.0 }
 0x19e   : > { %v1138_v48 = vmax.f32 %v1136_v46, 0.0 }
 0x19f   : > { %1139 = vrot.lane.b32.xlu0 %v6378_v47, %s6090_s27  ;;  %1149 = vrot.lane.b32.xlu1 %v6378_v47, %s6096_s9 }
 0x1a3   : > { %1307 = vrot.lane.b32.xlu0 %v6378_v47, %s6091_s28  ;;  %1151 = vrot.lane.b32.xlu1 %v1138_v48, %s6096_s9 }
 0x1a7   : > { %1393 = vrot.lane.b32.xlu0 %v6378_v47, %s6092_s29  ;;  %1141 = vrot.lane.b32.xlu1 %v1138_v48, %s6090_s27 }
 0x1ab   : > { %1557 = vrot.lane.b32.xlu0 %v6378_v47, %s6093_s30  ;;  %1309 = vrot.lane.b32.xlu1 %v1138_v48, %s6091_s28 }
 0x1af   : > { %1643 = vrot.lane.b32.xlu0 %v6378_v47, %s6094_s7  ;;  %1395 = vrot.lane.b32.xlu1 %v1138_v48, %s6092_s29 }
 0x1b3   : > { %1729 = vrot.lane.b32.xlu0 %v6378_v47, %s6095_s8  ;;  %1559 = vrot.lane.b32.xlu1 %v1138_v48, %s6093_s30 }
 0x1b7   : > { %1815 = vrot.lane.b32.xlu0 %v6378_v47, %s6097_s10  ;;  %1645 = vrot.lane.b32.xlu1 %v1138_v48, %s6094_s7 }
 0x1bb   : > { %1905 = vperm.xlu0 %6077, %v5845_v51   ;;  %1731 = vrot.lane.b32.xlu1 %v1138_v48, %s6095_s8  ;;  %v5837_v51 = vld [vmem:[%s7133_s2 + $0x70] sm:$0xff] }
 0x1bf   : > { %1817 = vrot.lane.b32.xlu1 %v1138_v48, %s6097_s10 }
 0x211   : > { %v1150_v52 = vpop.permute.xlu1 %1149  ;;  %v1140_v53 = vpop.permute.xlu0 %1139 }
 0x215   : > { %v1152_v54 = vpop.permute.xlu1 %1151  ;;  %v1308_v4 = vpop.permute.xlu0 %1307 }
 0x216   : > { %v1153_v55 = vsel %vm296_vm5, %v1150_v52, %v1152_v54  ;;  %v1154_v56 = vsel %vm296_vm5, %v1152_v54, %v1150_v52 }
 0x217   : > { %v1155_v57 = vmul.f32 %v1154_v56, %v6277_v50  ;;  %v1156_v58 = vmul.f32 %v1153_v55, %v6274_v49 }
 0x219   : > { %1162 = vmatprep.subr.mxu1 %v1156_v58  ;;  %v1142_v61 = vpop.permute.xlu1 %1141  ;;  %v1394_v21 = vpop.permute.xlu0 %1393  ;;  %v5839_v58 = vld [vmem:[%s7133_s2 + $0x78] sm:$0xff] }
 0x21a   : > { %v1143_v62 = vsel %vm275_vm1, %v1140_v53, %v1142_v61  ;;  %v1144_v3 = vsel %vm275_vm1, %v1142_v61, %v1140_v53  ;;  %1163 = vmatpush1.msra.mxu1 %v1155_v57 }
 0x21b   : > { %v1145_v5 = vmul.f32 %v1144_v3, %v6213_v15  ;;  %v1146_v6 = vmul.f32 %v1143_v62, %v6210_v14  ;;  %5829 = vmatmul.mubr.msk.f32.vlgmr.msra.gmra.mrb[2].mxu1 %vm314_vm3, %v5828_v59  ;;  %v5841_v3 = vld [vmem:[%s7133_s2 + $0x80] sm:$0xff] }
 0x21c   : > { %1300 = vmatprep.mubr.f32.mxu1 %v6089_v0 }
 0x21d   : > { %1236 = vmatprep.subr.mxu1 %v1146_v6  ;;  %v1310_v10 = vpop.permute.xlu1 %1309  ;;  %v1558_v9 = vpop.permute.xlu0 %1557  ;;  %v1915_v6 = vld [vmem:[%s7135_s4] sm:$0xff] }
 0x21e   : > { %v1311_v12 = vsel %vm467_vm0, %v1308_v4, %v1310_v10  ;;  %1237 = vmatpush1.msra.mxu1 %v1145_v5  ;;  %v1312_v18 = vsel %vm467_vm0, %v1310_v10, %v1308_v4  ;;  %v5843_v5 = vld [vmem:[%s7133_s2 + $0x88] sm:$0xff]  ;;  %5846 = vmatmul.mubr.msk.f32.vlgmr.msra.gmra.mrb[2].mxu0 %vm314_vm3, %v1915_v6  ;;  %v1914_v10 = vld [vmem:[%s7136_s5] sm:$0xff] }
 0x21f   : > { %v1314_v19 = vmul.f32 %v1311_v12, %v6216_v16  ;;  %v1313_v23 = vmul.f32 %v1312_v18, %v6219_v17  ;;  %2066 = vmatprep.mubr.f32.mxu0 %v6089_v0  ;;  %1992 = vperm.xlu1 %6078, %v1914_v10   ;;  %v5853_v10 = vld [vmem:[%s7133_s2 + $0xa0] sm:$0xff] }
 0x221   : > { %1320 = vmatprep.subr.mxu1 %v1314_v19  ;;  %v1396_v22 = vpop.permute.xlu1 %1395  ;;  %v1644_v38 = vpop.permute.xlu0 %1643 }
 0x222   : > { %v1397_v24 = vsel %vm565_vm2, %v1394_v21, %v1396_v22  ;;  %v1398_v29 = vsel %vm565_vm2, %v1396_v22, %v1394_v21 }
 0x223   : > { %v1400_v26 = vmul.f32 %v1397_v24, %v6237_v28  ;;  %5830 = vmatmul.mubr.msk.f32.vlgmr.msra.gmra.mrb[2].mxu1 %vm314_vm3, %v5827_v20  ;;  %v1399_v31 = vmul.f32 %v1398_v29, %v6249_v35  ;;  %v5847_v29 = vld [vmem:[%s7135_s4 + $0x8] sm:$0xff] }
 0x224   : > { %1321 = vmatpush1.msra.mxu1 %v1313_v23  ;;  %1384 = vmatprep.mubr.f32.mxu1 %v6089_v0 }
 0x225   : > { %1406 = vmatprep.subr.mxu1 %v1400_v26  ;;  %v1560_v32 = vpop.permute.xlu1 %1559  ;;  %v1730_v46 = vpop.permute.xlu0 %1729 }
 0x226   : > { %v1562_v34 = vsel %vm741_vm4, %v1560_v32, %v1558_v9  ;;  %v1561_v39 = vsel %vm741_vm4, %v1558_v9, %v1560_v32 }
 0x227   : > { %v1564_v8 = vmul.f32 %v1562_v34, %v6268_v45  ;;  %v1563_v42 = vmul.f32 %v1561_v39, %v6297_v60 }
 0x229   : > { %v1646_v37 = vpop.permute.xlu1 %1645  ;;  %v1816_v55 = vpop.permute.xlu0 %1815 }
 0x22a   : > { %v1648_v40 = vsel %vm839_vm6, %v1646_v37, %v1644_v38 }
 0x22b   : > { %5832 = vmatmul.mubr.msk.f32.vlgmr.msra.gmra.mrb[2].mxu1 %vm314_vm3, %v5831_v30  ;;  %v1650_v43 = vmul.f32 %v1648_v40, %v6305_v63 }
 0x22c   : > { %1407 = vmatpush1.msra.mxu1 %v1399_v31  ;;  %1470 = vmatprep.mubr.f32.mxu1 %v6089_v0 }
 0x22d   : > { %1484 = vmatprep.subr.mxu1 %v1138_v48  ;;  %v1732_v44 = vpop.permute.xlu1 %1731 }
 0x22e   : > { %v1734_v48 = vsel %vm937_vm7, %v1732_v44, %v1730_v46  ;;  %v1733_v56 = vsel %vm937_vm7, %v1730_v46, %v1732_v44  ;;  %v5850_v46 = vld [vmem:[%s7133_s2 + $0x98] sm:$0xff] }
 0x22f   : > { %v1736_v53 = vmul.f32 %v1734_v48, %v6328_v13  ;;  %v1735_v59 = vmul.f32 %v1733_v56, %v6344_v25 }
 0x231   : > { %v1818_v54 = vpop.permute.xlu1 %1817 }
 0x232   : > { %v1820_v57 = vsel %vm1035_vm8, %v1818_v54, %v1816_v55  ;;  %v1819_v62 = vsel %vm1035_vm8, %v1816_v55, %v1818_v54 }
 0x233   : > { %5834 = vmatmul.mubr.msk.f32.vlgmr.msra.gmra.mrb[2].mxu1 %vm314_vm3, %v5833_v36  ;;  %v1822_v61 = vmul.f32 %v1820_v57, %v6349_v27  ;;  %v1821_v4 = vmul.f32 %v1819_v62, %v6361_v33 }
 0x234   : > { %1485 = vmatpush1.msra.mxu1 %v6378_v47  ;;  %1548 = vmatprep.mubr.f32.mxu1 %v6089_v0  ;;  %v1647_v47 = vsel %vm839_vm6, %v1644_v38, %v1646_v37  ;;  %v5867_v37 = vld [vmem:[%s7134_s3 + $0x10] sm:$0xff] }
 0x235   : > { %1570 = vmatprep.subr.mxu1 %v1564_v8  ;;  %v1649_v52 = vmul.f32 %v1647_v47, %v6323_v11 }
 0x23a   : > { %v1906_v12 = vpop.permute.xlu0 %1905 }
 0x23b   : > { %5836 = vmatmul.mubr.msk.f32.vlgmr.msra.gmra.mrb[2].mxu1 %vm314_vm3, %v5835_v41 }
 0x23c   : > { %1571 = vmatpush1.msra.mxu1 %v1563_v42  ;;  %1634 = vmatprep.mubr.f32.mxu1 %v6089_v0 }
 0x23d   : > { %1656 = vmatprep.subr.mxu1 %v1650_v43 }
 0x243   : > { %5838 = vmatmul.mubr.msk.f32.vlgmr.msra.gmra.mrb[2].mxu1 %vm314_vm3, %v5837_v51 }
 0x244   : > { %1657 = vmatpush1.msra.mxu1 %v1649_v52  ;;  %1720 = vmatprep.mubr.f32.mxu1 %v6089_v0 }
 0x245   : > { %1742 = vmatprep.subr.mxu1 %v1736_v53 }
 0x24b   : > { %5840 = vmatmul.mubr.msk.f32.vlgmr.msra.gmra.mrb[2].mxu1 %vm314_vm3, %v5839_v58 }
 0x24c   : > { %1743 = vmatpush1.msra.mxu1 %v1735_v59  ;;  %1806 = vmatprep.mubr.f32.mxu1 %v6089_v0 }
 0x24d   : > { %1828 = vmatprep.subr.mxu1 %v1822_v61  ;;  %v5849_v61 = vld [vmem:[%s7133_s2 + $0x90] sm:$0xff] }
 0x253   : > { %5842 = vmatmul.mubr.msk.f32.vlgmr.msra.gmra.mrb[2].mxu1 %vm314_vm3, %v5841_v3 }
 0x254   : > { %1829 = vmatpush1.msra.mxu1 %v1821_v4  ;;  %1892 = vmatprep.mubr.f32.mxu1 %v6089_v0 }
 0x25b   : > { %5844 = vmatmul.mubr.msk.f32.vlgmr.msra.gmra.mrb[2].mxu1 %vm314_vm3, %v5843_v5 }
 0x25c   : > { %2164 = vmatprep.mubr.f32.mxu1 %v6089_v0 }
 0x29e   : > { %v1993_v30 = vpop.permute.xlu1 %1992 }
 0x32e   : > { %v1894_v18 = vpop.f32.mrb[2].mxu1 }
 0x32f   : > { %v1908_v19 = vadd.f32 %v1906_v12, %v1894_v18  ;;  %v1896_v20 = vpop.f32.mrb[3].mxu1 }
 0x330   : > { %v1909_v21 = vadd.f32 %v1906_v12, %v1896_v20 }
 0x331   : > { %v1910_v22 = vadd.f32 %v1908_v19, %v6155_v1 }
 0x332   : > { %v1911_v23 = vadd.f32 %v1909_v21, %v6162_v2  ;;  %v5855_v21 = vld [vmem:[%s7133_s2 + $0xa8] sm:$0xff] }
 0x333   : > { %v6513_v26 = vmax.f32 %v1910_v22, 0.0 }
 0x334   : > { %v6511_v24 = vmax.f32 %v1911_v23, 0.0 }
 0x336   : > { %2002 = vmatprep.subr.mxu0 %v6511_v24 }
 0x337   : > { %2003 = vmatpush1.msra.mxu0 %v6513_v26 }
 0x338   : > { %5848 = vmatmul.mubr.msk.f32.vlgmr.msra.gmra.mrb[2].mxu0 %vm314_vm3, %v5847_v29 }
 0x339   : > { %2937 = vmatprep.mubr.f32.mxu0 %v6089_v0 }
 0x40b   : > { %v2068_v31 = vpop.f32.mrb[2].mxu0 }
 0x40c   : > { %v5947_v32 = vadd.f32 %v2068_v31, %v1993_v30  ;;  %v2070_v9 = vpop.f32.mrb[3].mxu0 }
 0x40d   : > { %v5948_v34 = vadd.f32 %v2070_v9, %v1993_v30 }
 0x40e   : > { %v6522_v36 = vmax.f32 %v5947_v32, 0.0  ;;  %v5857_v32 = vld [vmem:[%s7133_s2 + $0xb0] sm:$0xff] }
 0x40f   : > { %v6524_v8 = vmax.f32 %v5948_v34, 0.0 }
 0x410   : > { %2087 = vrot.lane.b32.xlu0 %v6522_v36, %s6096_s9 }
 0x411   : > { %2089 = vrot.lane.b32.xlu1 %v6524_v8, %s6096_s9 }
 0x414   : > { %2077 = vrot.lane.b32.xlu0 %v6522_v36, %s6090_s27 }
 0x415   : > { %2079 = vrot.lane.b32.xlu1 %v6524_v8, %s6090_s27 }
 0x418   : > { %2245 = vrot.lane.b32.xlu0 %v6522_v36, %s6091_s28 }
 0x419   : > { %2247 = vrot.lane.b32.xlu1 %v6524_v8, %s6091_s28 }
 0x41c   : > { %2331 = vrot.lane.b32.xlu0 %v6522_v36, %s6092_s29 }
 0x41d   : > { %2333 = vrot.lane.b32.xlu1 %v6524_v8, %s6092_s29 }
 0x420   : > { %2495 = vrot.lane.b32.xlu0 %v6522_v36, %s6093_s30 }
 0x421   : > { %2497 = vrot.lane.b32.xlu1 %v6524_v8, %s6093_s30 }
 0x424   : > { %2581 = vrot.lane.b32.xlu0 %v6522_v36, %s6094_s7 }
 0x425   : > { %2583 = vrot.lane.b32.xlu1 %v6524_v8, %s6094_s7 }
 0x428   : > { %2667 = vrot.lane.b32.xlu0 %v6522_v36, %s6095_s8 }
 0x429   : > { %2669 = vrot.lane.b32.xlu1 %v6524_v8, %s6095_s8 }
 0x42c   : > { %2753 = vrot.lane.b32.xlu0 %v6522_v36, %s6097_s10 }
 0x42d   : > { %2755 = vrot.lane.b32.xlu1 %v6524_v8, %s6097_s10 }
 0x430   : > { %2843 = vperm.xlu0 %6077, %v5867_v37  }
 0x482   : > { %v2088_v38 = vpop.permute.xlu0 %2087 }
 0x483   : > { %v2090_v39 = vpop.permute.xlu1 %2089 }
 0x484   : > { %v2091_v40 = vsel %vm296_vm5, %v2088_v38, %v2090_v39  ;;  %v2092_v41 = vsel %vm296_vm5, %v2090_v39, %v2088_v38 }
 0x485   : > { %v2093_v42 = vmul.f32 %v2092_v41, %v6277_v50  ;;  %v2094_v43 = vmul.f32 %v2091_v40, %v6274_v49  ;;  %v5859_v41 = vld [vmem:[%s7133_s2 + $0xb8] sm:$0xff] }
 0x486   : > { %v2078_v44 = vpop.permute.xlu0 %2077 }
 0x487   : > { %v2080_v47 = vpop.permute.xlu1 %2079  ;;  %2100 = vmatprep.subr.mxu1 %v2094_v43 }
 0x488   : > { %v2081_v48 = vsel %vm275_vm1, %v2078_v44, %v2080_v47  ;;  %v2082_v51 = vsel %vm275_vm1, %v2080_v47, %v2078_v44  ;;  %2101 = vmatpush1.msra.mxu1 %v2093_v42 }
 0x489   : > { %v2083_v52 = vmul.f32 %v2082_v51, %v6213_v15  ;;  %v2084_v53 = vmul.f32 %v2081_v48, %v6210_v14  ;;  %5851 = vmatmul.mubr.msk.f32.vlgmr.msra.gmra.mrb[4].mxu1 %vm314_vm3, %v5850_v46  ;;  %v5861_v51 = vld [vmem:[%s7133_s2 + $0xc0] sm:$0xff] }
 0x48a   : > { %v2246_v54 = vpop.permute.xlu0 %2245  ;;  %2238 = vmatprep.mubr.f32.mxu1 %v6089_v0 }
 0x48b   : > { %v2248_v55 = vpop.permute.xlu1 %2247  ;;  %2174 = vmatprep.subr.mxu1 %v2084_v53 }
 0x48c   : > { %v2249_v56 = vsel %vm467_vm0, %v2246_v54, %v2248_v55  ;;  %2175 = vmatpush1.msra.mxu1 %v2083_v52  ;;  %v2250_v57 = vsel %vm467_vm0, %v2248_v55, %v2246_v54  ;;  %v5863_v55 = vld [vmem:[%s7133_s2 + $0xc8] sm:$0xff] }
 0x48d   : > { %v2252_v58 = vmul.f32 %v2249_v56, %v6216_v16  ;;  %v2251_v3 = vmul.f32 %v2250_v57, %v6219_v17  ;;  %v5865_v57 = vld [vmem:[%s7133_s2 + $0xd0] sm:$0xff] }
 0x48e   : > { %v2332_v59 = vpop.permute.xlu0 %2331 }
 0x48f   : > { %v2334_v62 = vpop.permute.xlu1 %2333  ;;  %2258 = vmatprep.subr.mxu1 %v2252_v58  ;;  %v5888_v58 = vld [vmem:[%s7135_s4 + $0x10] sm:$0xff] }
 0x490   : > { %v2335_v4 = vsel %vm565_vm2, %v2332_v59, %v2334_v62  ;;  %v2336_v6 = vsel %vm565_vm2, %v2334_v62, %v2332_v59 }
 0x491   : > { %v2338_v5 = vmul.f32 %v2335_v4, %v6237_v28  ;;  %5852 = vmatmul.mubr.msk.f32.vlgmr.msra.gmra.mrb[4].mxu1 %vm314_vm3, %v5849_v61  ;;  %v2337_v12 = vmul.f32 %v2336_v6, %v6249_v35  ;;  %v5887_v6 = vld [vmem:[%s7136_s5 + $0x8] sm:$0xff] }
 0x492   : > { %2259 = vmatpush1.msra.mxu1 %v2251_v3  ;;  %2322 = vmatprep.mubr.f32.mxu1 %v6089_v0  ;;  %v2496_v18 = vpop.permute.xlu0 %2495 }
 0x493   : > { %2344 = vmatprep.subr.mxu1 %v2338_v5  ;;  %v2498_v19 = vpop.permute.xlu1 %2497  ;;  %v5886_v5 = vld [vmem:[%s7134_s3 + $0x18] sm:$0xff] }
 0x494   : > { %v2500_v20 = vsel %vm741_vm4, %v2498_v19, %v2496_v18  ;;  %v2499_v30 = vsel %vm741_vm4, %v2496_v18, %v2498_v19 }
 0x495   : > { %v2502_v22 = vmul.f32 %v2500_v20, %v6268_v45  ;;  %v2501_v9 = vmul.f32 %v2499_v30, %v6297_v60 }
 0x496   : > { %v2582_v23 = vpop.permute.xlu0 %2581 }
 0x497   : > { %v2584_v29 = vpop.permute.xlu1 %2583 }
 0x498   : > { %v2586_v31 = vsel %vm839_vm6, %v2584_v29, %v2582_v23  ;;  %v2585_v39 = vsel %vm839_vm6, %v2582_v23, %v2584_v29  ;;  %v5869_v23 = vld [vmem:[%s7133_s2 + $0xe0] sm:$0xff] }
 0x499   : > { %5854 = vmatmul.mubr.msk.f32.vlgmr.msra.gmra.mrb[4].mxu1 %vm314_vm3, %v5853_v10  ;;  %v2588_v34 = vmul.f32 %v2586_v31, %v6305_v63  ;;  %v2587_v42 = vmul.f32 %v2585_v39, %v6323_v11 }
 0x49a   : > { %2345 = vmatpush1.msra.mxu1 %v2337_v12  ;;  %2408 = vmatprep.mubr.f32.mxu1 %v6089_v0  ;;  %v2668_v37 = vpop.permute.xlu0 %2667 }
 0x49b   : > { %2422 = vmatprep.subr.mxu1 %v6524_v8  ;;  %v2670_v38 = vpop.permute.xlu1 %2669 }
 0x49c   : > { %v2672_v40 = vsel %vm937_vm7, %v2670_v38, %v2668_v37  ;;  %v2671_v47 = vsel %vm937_vm7, %v2668_v37, %v2670_v38 }
 0x49d   : > { %v2674_v43 = vmul.f32 %v2672_v40, %v6328_v13  ;;  %v2673_v52 = vmul.f32 %v2671_v47, %v6344_v25 }
 0x49e   : > { %v2754_v44 = vpop.permute.xlu0 %2753 }
 0x49f   : > { %v2756_v46 = vpop.permute.xlu1 %2755 }
 0x4a0   : > { %v2758_v48 = vsel %vm1035_vm8, %v2756_v46, %v2754_v44  ;;  %v2757_v54 = vsel %vm1035_vm8, %v2754_v44, %v2756_v46 }
 0x4a1   : > { %5856 = vmatmul.mubr.msk.f32.vlgmr.msra.gmra.mrb[4].mxu1 %vm314_vm3, %v5855_v21  ;;  %v2760_v53 = vmul.f32 %v2758_v48, %v6349_v27  ;;  %v2759_v56 = vmul.f32 %v2757_v54, %v6361_v33 }
 0x4a2   : > { %2423 = vmatpush1.msra.mxu1 %v6522_v36  ;;  %2486 = vmatprep.mubr.f32.mxu1 %v6089_v0 }
 0x4a3   : > { %2508 = vmatprep.subr.mxu1 %v2502_v22 }
 0x4a9   : > { %5858 = vmatmul.mubr.msk.f32.vlgmr.msra.gmra.mrb[4].mxu1 %vm314_vm3, %v5857_v32 }
 0x4aa   : > { %2509 = vmatpush1.msra.mxu1 %v2501_v9  ;;  %2572 = vmatprep.mubr.f32.mxu1 %v6089_v0 }
 0x4ab   : > { %2594 = vmatprep.subr.mxu1 %v2588_v34 }
 0x4b1   : > { %5860 = vmatmul.mubr.msk.f32.vlgmr.msra.gmra.mrb[4].mxu1 %vm314_vm3, %v5859_v41 }
 0x4b2   : > { %2595 = vmatpush1.msra.mxu1 %v2587_v42  ;;  %2658 = vmatprep.mubr.f32.mxu1 %v6089_v0  ;;  %v5868_v42 = vld [vmem:[%s7133_s2 + $0xd8] sm:$0xff] }
 0x4b3   : > { %2680 = vmatprep.subr.mxu1 %v2674_v43 }
 0x4b9   : > { %5862 = vmatmul.mubr.msk.f32.vlgmr.msra.gmra.mrb[4].mxu1 %vm314_vm3, %v5861_v51  ;;  %v5872_v51 = vld [vmem:[%s7133_s2 + $0xe8] sm:$0xff] }
 0x4ba   : > { %2681 = vmatpush1.msra.mxu1 %v2673_v52  ;;  %2744 = vmatprep.mubr.f32.mxu1 %v6089_v0 }
 0x4bb   : > { %2766 = vmatprep.subr.mxu1 %v2760_v53 }
 0x4c1   : > { %5864 = vmatmul.mubr.msk.f32.vlgmr.msra.gmra.mrb[4].mxu1 %vm314_vm3, %v5863_v55 }
 0x4c2   : > { %2767 = vmatpush1.msra.mxu1 %v2759_v56  ;;  %2830 = vmatprep.mubr.f32.mxu1 %v6089_v0  ;;  %v5874_v56 = vld [vmem:[%s7133_s2 + $0xf0] sm:$0xff] }
 0x4c3   : > { %3632 = vmatprep.subr.mxu1 %v6162_v2  ;;  %v2844_v2 = vpop.permute.xlu0 %2843 }
 0x4c9   : > { %5866 = vmatmul.mubr.msk.f32.vlgmr.msra.gmra.mrb[4].mxu1 %vm314_vm3, %v5865_v57 }
 0x4ca   : > { %3633 = vmatpush1.msra.mxu1 %v6155_v1  ;;  %3696 = vmatprep.mubr.f32.mxu1 %v6089_v0 }
 0x4cb   : > { %3715 = vmatprep.subr.mxu1 %v6511_v24 }
 0x4cd   : > { %5889 = vmatmul.mubr.msk.f32.vlgmr.msra.gmra.mrb[6].mxu1 %vm314_vm3, %v5888_v58 }
 0x4ce   : > { %3716 = vmatpush1.msra.mxu1 %v6513_v26  ;;  %3779 = vmatprep.mubr.f32.mxu1 %v6089_v0 }
 0x59c   : > { %v2832_v59 = vpop.f32.mrb[4].mxu1 }
 0x59d   : > { %v2846_v61 = vadd.f32 %v2844_v2, %v2832_v59  ;;  %v2834_v62 = vpop.f32.mrb[5].mxu1 }
 0x59e   : > { %v2847_v3 = vadd.f32 %v2844_v2, %v2834_v62  ;;  %v5876_v62 = vld [vmem:[%s7133_s2 + $0xf8] sm:$0xff] }
 0x59f   : > { %v6665_v1 = vmax.f32 %v2846_v61, 0.0 }
 0x5a0   : > { %v6667_v4 = vmax.f32 %v2847_v3, 0.0 }
 0x5a1   : > { %2860 = vrot.lane.b32.xlu1 %v6665_v1, %s6096_s9 }
 0x5a2   : > { %2862 = vrot.lane.b32.xlu0 %v6667_v4, %s6096_s9 }
 0x5a5   : > { %2850 = vrot.lane.b32.xlu1 %v6665_v1, %s6090_s27 }
 0x5a6   : > { %2852 = vrot.lane.b32.xlu0 %v6667_v4, %s6090_s27 }
 0x5a9   : > { %3018 = vrot.lane.b32.xlu1 %v6665_v1, %s6091_s28 }
 0x5aa   : > { %3020 = vrot.lane.b32.xlu0 %v6667_v4, %s6091_s28 }
 0x5ad   : > { %3104 = vrot.lane.b32.xlu1 %v6665_v1, %s6092_s29 }
 0x5ae   : > { %3106 = vrot.lane.b32.xlu0 %v6667_v4, %s6092_s29 }
 0x5b1   : > { %3268 = vrot.lane.b32.xlu1 %v6665_v1, %s6093_s30 }
 0x5b2   : > { %3270 = vrot.lane.b32.xlu0 %v6667_v4, %s6093_s30 }
 0x5b5   : > { %3354 = vrot.lane.b32.xlu1 %v6665_v1, %s6094_s7 }
 0x5b6   : > { %3356 = vrot.lane.b32.xlu0 %v6667_v4, %s6094_s7 }
 0x5b9   : > { %3440 = vrot.lane.b32.xlu1 %v6665_v1, %s6095_s8 }
 0x5ba   : > { %3442 = vrot.lane.b32.xlu0 %v6667_v4, %s6095_s8 }
 0x5bd   : > { %3526 = vrot.lane.b32.xlu1 %v6665_v1, %s6097_s10 }
 0x5be   : > { %3528 = vrot.lane.b32.xlu0 %v6667_v4, %s6097_s10 }
 0x5c1   : > { %3616 = vperm.xlu1 %6078, %v5886_v5  }
 0x5c2   : > { %3705 = vperm.xlu0 %6077, %v5887_v6  }
 0x613   : > { %v2861_v10 = vpop.permute.xlu1 %2860 }
 0x614   : > { %v2863_v12 = vpop.permute.xlu0 %2862 }
 0x615   : > { %v2864_v18 = vsel %vm296_vm5, %v2861_v10, %v2863_v12  ;;  %v2865_v19 = vsel %vm296_vm5, %v2863_v12, %v2861_v10  ;;  %v5878_v12 = vld [vmem:[%s7133_s2 + $0x100] sm:$0xff] }
 0x616   : > { %v2866_v20 = vmul.f32 %v2865_v19, %v6277_v50  ;;  %v2867_v21 = vmul.f32 %v2864_v18, %v6274_v49 }
 0x617   : > { %v2851_v22 = vpop.permute.xlu1 %2850 }
 0x618   : > { %v2853_v29 = vpop.permute.xlu0 %2852  ;;  %2873 = vmatprep.subr.mxu0 %v2867_v21 }
 0x619   : > { %v2854_v30 = vsel %vm275_vm1, %v2851_v22, %v2853_v29  ;;  %v2855_v31 = vsel %vm275_vm1, %v2853_v29, %v2851_v22  ;;  %2874 = vmatpush1.msra.mxu0 %v2866_v20  ;;  %v5880_v29 = vld [vmem:[%s7133_s2 + $0x108] sm:$0xff] }
 0x61a   : > { %v2856_v32 = vmul.f32 %v2855_v31, %v6213_v15  ;;  %v2857_v9 = vmul.f32 %v2854_v30, %v6210_v14  ;;  %5870 = vmatmul.mubr.msk.f32.vlgmr.msra.gmra.mrb[4].mxu0 %vm314_vm3, %v5869_v23 }
 0x61b   : > { %v3019_v34 = vpop.permute.xlu1 %3018  ;;  %3011 = vmatprep.mubr.f32.mxu0 %v6089_v0 }
 0x61c   : > { %v3021_v37 = vpop.permute.xlu0 %3020  ;;  %2947 = vmatprep.subr.mxu0 %v2857_v9  ;;  %v5882_v9 = vld [vmem:[%s7133_s2 + $0x110] sm:$0xff] }
 0x61d   : > { %v3022_v38 = vsel %vm467_vm0, %v3019_v34, %v3021_v37  ;;  %2948 = vmatpush1.msra.mxu0 %v2856_v32  ;;  %v3023_v39 = vsel %vm467_vm0, %v3021_v37, %v3019_v34  ;;  %v5884_v37 = vld [vmem:[%s7133_s2 + $0x118] sm:$0xff] }
 0x61e   : > { %v3025_v40 = vmul.f32 %v3022_v38, %v6216_v16  ;;  %v3024_v44 = vmul.f32 %v3023_v39, %v6219_v17  ;;  %v5890_v38 = vld [vmem:[%s7135_s4 + $0x18] sm:$0xff] }
 0x61f   : > { %v3105_v41 = vpop.permute.xlu1 %3104  ;;  %5891 = vmatmul.mubr.msk.f32.vlgmr.msra.gmra.mrb[6].mxu1 %vm314_vm3, %v5890_v38  ;;  %v5898_v38 = vld [vmem:[%s7133_s2 + $0x130] sm:$0xff] }
 0x620   : > { %v3107_v43 = vpop.permute.xlu0 %3106  ;;  %3031 = vmatprep.subr.mxu0 %v3025_v40  ;;  %3857 = vmatprep.mubr.f32.mxu1 %v6089_v0 }
 0x621   : > { %v3108_v46 = vsel %vm565_vm2, %v3105_v41, %v3107_v43  ;;  %v3109_v48 = vsel %vm565_vm2, %v3107_v43, %v3105_v41 }
 0x622   : > { %v3111_v47 = vmul.f32 %v3108_v46, %v6237_v28  ;;  %5871 = vmatmul.mubr.msk.f32.vlgmr.msra.gmra.mrb[4].mxu0 %vm314_vm3, %v5868_v42  ;;  %v3110_v52 = vmul.f32 %v3109_v48, %v6249_v35 }
 0x623   : > { %3032 = vmatpush1.msra.mxu0 %v3024_v44  ;;  %3095 = vmatprep.mubr.f32.mxu0 %v6089_v0  ;;  %v3269_v53 = vpop.permute.xlu1 %3268 }
 0x624   : > { %3117 = vmatprep.subr.mxu0 %v3111_v47  ;;  %v3271_v54 = vpop.permute.xlu0 %3270 }
 0x625   : > { %v3273_v55 = vsel %vm741_vm4, %v3271_v54, %v3269_v53  ;;  %v3272_v59 = vsel %vm741_vm4, %v3269_v53, %v3271_v54 }
 0x626   : > { %v3275_v57 = vmul.f32 %v3273_v55, %v6268_v45  ;;  %v3274_v3 = vmul.f32 %v3272_v59, %v6297_v60 }
 0x627   : > { %v3355_v58 = vpop.permute.xlu1 %3354 }
 0x628   : > { %v3357_v2 = vpop.permute.xlu0 %3356 }
 0x629   : > { %v3359_v61 = vsel %vm839_vm6, %v3357_v2, %v3355_v58  ;;  %v3358_v6 = vsel %vm839_vm6, %v3355_v58, %v3357_v2 }
 0x62a   : > { %5873 = vmatmul.mubr.msk.f32.vlgmr.msra.gmra.mrb[4].mxu0 %vm314_vm3, %v5872_v51  ;;  %v3360_v18 = vmul.f32 %v3358_v6, %v6323_v11  ;;  %v5892_v51 = vld [vmem:[%s7135_s4 + $0x20] sm:$0xff] }
 0x62b   : > { %3118 = vmatpush1.msra.mxu0 %v3110_v52  ;;  %3181 = vmatprep.mubr.f32.mxu0 %v6089_v0 }
 0x62c   : > { %3195 = vmatprep.subr.mxu0 %v6667_v4  ;;  %v3361_v4 = vmul.f32 %v3359_v61, %v6305_v63  ;;  %v3443_v5 = vpop.permute.xlu0 %3442 }
 0x630   : > { %v3529_v21 = vpop.permute.xlu0 %3528 }
 0x632   : > { %5875 = vmatmul.mubr.msk.f32.vlgmr.msra.gmra.mrb[4].mxu0 %vm314_vm3, %v5874_v56 }
 0x633   : > { %3196 = vmatpush1.msra.mxu0 %v6665_v1  ;;  %3259 = vmatprep.mubr.f32.mxu0 %v6089_v0  ;;  %v3441_v1 = vpop.permute.xlu1 %3440 }
 0x634   : > { %3281 = vmatprep.subr.mxu0 %v3275_v57  ;;  %v3445_v10 = vsel %vm937_vm7, %v3443_v5, %v3441_v1  ;;  %v3444_v22 = vsel %vm937_vm7, %v3441_v1, %v3443_v5  ;;  %v5912_v57 = vld [vmem:[%s7134_s3 + $0x20] sm:$0xff]  ;;  %v5895_v1 = vld [vmem:[%s7133_s2 + $0x128] sm:$0xff] }
 0x635   : > { %v3447_v19 = vmul.f32 %v3445_v10, %v6328_v13  ;;  %v3446_v30 = vmul.f32 %v3444_v22, %v6344_v25 }
 0x637   : > { %v3527_v20 = vpop.permute.xlu1 %3526 }
 0x638   : > { %v3531_v23 = vsel %vm1035_vm8, %v3529_v21, %v3527_v20  ;;  %v3530_v32 = vsel %vm1035_vm8, %v3527_v20, %v3529_v21 }
 0x639   : > { %v3533_v31 = vmul.f32 %v3531_v23, %v6349_v27  ;;  %v3532_v34 = vmul.f32 %v3530_v32, %v6361_v33 }
 0x63a   : > { %5877 = vmatmul.mubr.msk.f32.vlgmr.msra.gmra.mrb[4].mxu0 %vm314_vm3, %v5876_v62 }
 0x63b   : > { %3282 = vmatpush1.msra.mxu0 %v3274_v3  ;;  %3345 = vmatprep.mubr.f32.mxu0 %v6089_v0 }
 0x63c   : > { %3367 = vmatprep.subr.mxu0 %v3361_v4 }
 0x640   : > { %v3617_v39 = vpop.permute.xlu1 %3616 }
 0x642   : > { %5879 = vmatmul.mubr.msk.f32.vlgmr.msra.gmra.mrb[4].mxu0 %vm314_vm3, %v5878_v12 }
 0x643   : > { %3368 = vmatpush1.msra.mxu0 %v3360_v18  ;;  %3431 = vmatprep.mubr.f32.mxu0 %v6089_v0 }
 0x644   : > { %3453 = vmatprep.subr.mxu0 %v3447_v19 }
 0x64a   : > { %5881 = vmatmul.mubr.msk.f32.vlgmr.msra.gmra.mrb[4].mxu0 %vm314_vm3, %v5880_v29 }
 0x64b   : > { %3454 = vmatpush1.msra.mxu0 %v3446_v30  ;;  %3517 = vmatprep.mubr.f32.mxu0 %v6089_v0  ;;  %v5894_v30 = vld [vmem:[%s7133_s2 + $0x120] sm:$0xff] }
 0x64c   : > { %3539 = vmatprep.subr.mxu0 %v3533_v31 }
 0x652   : > { %5883 = vmatmul.mubr.msk.f32.vlgmr.msra.gmra.mrb[4].mxu0 %vm314_vm3, %v5882_v9 }
 0x653   : > { %3540 = vmatpush1.msra.mxu0 %v3532_v34  ;;  %3603 = vmatprep.mubr.f32.mxu0 %v6089_v0 }
 0x65a   : > { %5885 = vmatmul.mubr.msk.f32.vlgmr.msra.gmra.mrb[4].mxu0 %vm314_vm3, %v5884_v37 }
 0x65b   : > { %3955 = vmatprep.mubr.f32.mxu0 %v6089_v0 }
 0x72d   : > { %v3605_v40 = vpop.f32.mrb[4].mxu0 }
 0x72e   : > { %v3619_v41 = vadd.f32 %v3617_v39, %v3605_v40  ;;  %v3607_v42 = vpop.f32.mrb[5].mxu0 }
 0x72f   : > { %v3620_v43 = vadd.f32 %v3617_v39, %v3607_v42 }
 0x730   : > { %v6808_v44 = vadd.f32 %v3619_v41, %v6522_v36  ;;  %v3706_v36 = vpop.permute.xlu0 %3705 }
 0x731   : > { %v6811_v46 = vadd.f32 %v3620_v43, %v6524_v8  ;;  %v5900_v43 = vld [vmem:[%s7133_s2 + $0x138] sm:$0xff] }
 0x732   : > { %v3623_v48 = vmax.f32 %v6808_v44, 0.0  ;;  %v5931_v44 = vld [vmem:[%s7134_s3 + $0x28] sm:$0xff] }
 0x733   : > { %v3624_v47 = vmax.f32 %v6811_v46, 0.0 }
 0x735   : > { %3793 = vmatprep.subr.mxu1 %v3624_v47 }
 0x736   : > { %3794 = vmatpush1.msra.mxu1 %v3623_v48 }
 0x737   : > { %5893 = vmatmul.mubr.msk.f32.vlgmr.msra.gmra.mrb[6].mxu1 %vm314_vm3, %v5892_v51 }
 0x738   : > { %4728 = vmatprep.mubr.f32.mxu1 %v6089_v0 }
 0x80a   : > { %v3859_v8 = vpop.f32.mrb[6].mxu1 }
 0x80b   : > { %v5949_v52 = vadd.f32 %v3859_v8, %v3706_v36  ;;  %v3861_v53 = vpop.f32.mrb[7].mxu1 }
 0x80c   : > { %v5950_v54 = vadd.f32 %v3861_v53, %v3706_v36 }
 0x80d   : > { %v6824_v55 = vmax.f32 %v5949_v52, 0.0 }
 0x80e   : > { %v6826_v56 = vmax.f32 %v5950_v54, 0.0  ;;  %v5902_v54 = vld [vmem:[%s7133_s2 + $0x140] sm:$0xff] }
 0x80f   : > { %3878 = vrot.lane.b32.xlu1 %v6824_v55, %s6096_s9 }
 0x810   : > { %3880 = vrot.lane.b32.xlu0 %v6826_v56, %s6096_s9 }
 0x813   : > { %3868 = vrot.lane.b32.xlu1 %v6824_v55, %s6090_s27 }
 0x814   : > { %3870 = vrot.lane.b32.xlu0 %v6826_v56, %s6090_s27 }
 0x817   : > { %4036 = vrot.lane.b32.xlu1 %v6824_v55, %s6091_s28 }
 0x818   : > { %4038 = vrot.lane.b32.xlu0 %v6826_v56, %s6091_s28 }
 0x81b   : > { %4122 = vrot.lane.b32.xlu1 %v6824_v55, %s6092_s29 }
 0x81c   : > { %4124 = vrot.lane.b32.xlu0 %v6826_v56, %s6092_s29 }
 0x81f   : > { %4286 = vrot.lane.b32.xlu1 %v6824_v55, %s6093_s30 }
 0x820   : > { %4288 = vrot.lane.b32.xlu0 %v6826_v56, %s6093_s30 }
 0x823   : > { %4372 = vrot.lane.b32.xlu1 %v6824_v55, %s6094_s7 }
 0x824   : > { %4374 = vrot.lane.b32.xlu0 %v6826_v56, %s6094_s7 }
 0x827   : > { %4458 = vrot.lane.b32.xlu1 %v6824_v55, %s6095_s8 }
 0x828   : > { %4460 = vrot.lane.b32.xlu0 %v6826_v56, %s6095_s8 }
 0x82b   : > { %4544 = vrot.lane.b32.xlu1 %v6824_v55, %s6097_s10 }
 0x82c   : > { %4546 = vrot.lane.b32.xlu0 %v6826_v56, %s6097_s10 }
 0x82f   : > { %4634 = vperm.xlu1 %6078, %v5912_v57  }
 0x881   : > { %v3879_v58 = vpop.permute.xlu1 %3878 }
 0x882   : > { %v3881_v2 = vpop.permute.xlu0 %3880 }
 0x883   : > { %v3882_v59 = vsel %vm296_vm5, %v3879_v58, %v3881_v2  ;;  %v3883_v61 = vsel %vm296_vm5, %v3881_v2, %v3879_v58 }
 0x884   : > { %v3884_v62 = vmul.f32 %v3883_v61, %v6277_v50  ;;  %v3885_v3 = vmul.f32 %v3882_v59, %v6274_v49 }
 0x885   : > { %v3869_v4 = vpop.permute.xlu1 %3868 }
 0x886   : > { %3891 = vmatprep.subr.mxu0 %v3885_v3  ;;  %v3871_v5 = vpop.permute.xlu0 %3870  ;;  %v5904_v3 = vld [vmem:[%s7133_s2 + $0x148] sm:$0xff] }
 0x887   : > { %v3872_v6 = vsel %vm275_vm1, %v3869_v4, %v3871_v5  ;;  %v3873_v10 = vsel %vm275_vm1, %v3871_v5, %v3869_v4  ;;  %3892 = vmatpush1.msra.mxu0 %v3884_v62 }
 0x888   : > { %v3874_v12 = vmul.f32 %v3873_v10, %v6213_v15  ;;  %v3875_v18 = vmul.f32 %v3872_v6, %v6210_v14  ;;  %5896 = vmatmul.mubr.msk.f32.vlgmr.msra.gmra.mrb[6].mxu0 %vm314_vm3, %v5895_v1 }
 0x889   : > { %v4037_v19 = vpop.permute.xlu1 %4036  ;;  %4029 = vmatprep.mubr.f32.mxu0 %v6089_v0 }
 0x88a   : > { %3965 = vmatprep.subr.mxu0 %v3875_v18  ;;  %v4039_v20 = vpop.permute.xlu0 %4038  ;;  %v5906_v18 = vld [vmem:[%s7133_s2 + $0x150] sm:$0xff] }
 0x88b   : > { %v4040_v21 = vsel %vm467_vm0, %v4037_v19, %v4039_v20  ;;  %3966 = vmatpush1.msra.mxu0 %v3874_v12  ;;  %v4041_v22 = vsel %vm467_vm0, %v4039_v20, %v4037_v19 }
 0x88c   : > { %v4043_v23 = vmul.f32 %v4040_v21, %v6216_v16  ;;  %v4042_v32 = vmul.f32 %v4041_v22, %v6219_v17  ;;  %v5908_v22 = vld [vmem:[%s7133_s2 + $0x158] sm:$0xff] }
 0x88d   : > { %v4123_v29 = vpop.permute.xlu1 %4122 }
 0x88e   : > { %4049 = vmatprep.subr.mxu0 %v4043_v23  ;;  %v4125_v31 = vpop.permute.xlu0 %4124 }
 0x88f   : > { %v4126_v9 = vsel %vm565_vm2, %v4123_v29, %v4125_v31  ;;  %v4127_v37 = vsel %vm565_vm2, %v4125_v31, %v4123_v29  ;;  %v6079_v29 = vld [vmem:[%s6152_s26 + $0x8] sm:$0xff]  ;;  %v6080_v31 = vld [vmem:[%s6152_s26] sm:$0xff] }
 0x890   : > { %v4129_v34 = vmul.f32 %v4126_v9, %v6237_v28  ;;  %5897 = vmatmul.mubr.msk.f32.vlgmr.msra.gmra.mrb[6].mxu0 %vm314_vm3, %v5894_v30  ;;  %v4128_v39 = vmul.f32 %v4127_v37, %v6249_v35  ;;  %v5910_v30 = vld [vmem:[%s7133_s2 + $0x160] sm:$0xff]  ;;  %v5935_v9 = vld [vmem:[%s7135_s4 + $0x30] sm:$0xff] }
 0x891   : > { %4050 = vmatpush1.msra.mxu0 %v4042_v32  ;;  %4113 = vmatprep.mubr.f32.mxu0 %v6089_v0  ;;  %v4287_v40 = vpop.permute.xlu1 %4286  ;;  %v5933_v32 = vld [vmem:[%s7135_s4 + $0x28] sm:$0xff] }
 0x892   : > { %4135 = vmatprep.subr.mxu0 %v4129_v34  ;;  %v4289_v41 = vpop.permute.xlu0 %4288 }
 0x893   : > { %v4291_v42 = vsel %vm741_vm4, %v4289_v41, %v4287_v40  ;;  %v4290_v52 = vsel %vm741_vm4, %v4287_v40, %v4289_v41 }
 0x894   : > { %v4293_v51 = vmul.f32 %v4291_v42, %v6268_v45  ;;  %v4292_v57 = vmul.f32 %v4290_v52, %v6297_v60 }
 0x895   : > { %v4373_v36 = vpop.permute.xlu1 %4372 }
 0x896   : > { %v4375_v8 = vpop.permute.xlu0 %4374 }
 0x897   : > { %v4377_v53 = vsel %vm839_vm6, %v4375_v8, %v4373_v36  ;;  %v4376_v61 = vsel %vm839_vm6, %v4373_v36, %v4375_v8  ;;  %v5914_v8 = vld [vmem:[%s7133_s2 + $0x170] sm:$0xff] }
 0x898   : > { %5899 = vmatmul.mubr.msk.f32.vlgmr.msra.gmra.mrb[6].mxu0 %vm314_vm3, %v5898_v38  ;;  %v4379_v58 = vmul.f32 %v4377_v53, %v6305_v63  ;;  %v4378_v4 = vmul.f32 %v4376_v61, %v6323_v11 }
 0x899   : > { %4136 = vmatpush1.msra.mxu0 %v4128_v39  ;;  %4199 = vmatprep.mubr.f32.mxu0 %v6089_v0  ;;  %v4459_v2 = vpop.permute.xlu1 %4458 }
 0x89a   : > { %4213 = vmatprep.subr.mxu0 %v6826_v56  ;;  %v4461_v59 = vpop.permute.xlu0 %4460 }
 0x89b   : > { %v4463_v62 = vsel %vm937_vm7, %v4461_v59, %v4459_v2  ;;  %v4462_v10 = vsel %vm937_vm7, %v4459_v2, %v4461_v59 }
 0x89c   : > { %v4465_v1 = vmul.f32 %v4463_v62, %v6328_v13  ;;  %v4464_v19 = vmul.f32 %v4462_v10, %v6344_v25 }
 0x89d   : > { %v4545_v5 = vpop.permute.xlu1 %4544 }
 0x89e   : > { %v4547_v6 = vpop.permute.xlu0 %4546 }
 0x89f   : > { %v4549_v12 = vsel %vm1035_vm8, %v4547_v6, %v4545_v5  ;;  %v4548_v21 = vsel %vm1035_vm8, %v4545_v5, %v4547_v6  ;;  %v5917_v5 = vld [vmem:[%s7133_s2 + $0x178] sm:$0xff] }
 0x8a0   : > { %5901 = vmatmul.mubr.msk.f32.vlgmr.msra.gmra.mrb[6].mxu0 %vm314_vm3, %v5900_v43  ;;  %v4551_v20 = vmul.f32 %v4549_v12, %v6349_v27  ;;  %v4550_v23 = vmul.f32 %v4548_v21, %v6361_v33  ;;  %v5919_v12 = vld [vmem:[%s7133_s2 + $0x180] sm:$0xff] }
 0x8a1   : > { %4214 = vmatpush1.msra.mxu0 %v6824_v55  ;;  %4277 = vmatprep.mubr.f32.mxu0 %v6089_v0 }
 0x8a2   : > { %4299 = vmatprep.subr.mxu0 %v4293_v51 }
 0x8a8   : > { %5903 = vmatmul.mubr.msk.f32.vlgmr.msra.gmra.mrb[6].mxu0 %vm314_vm3, %v5902_v54 }
 0x8a9   : > { %4300 = vmatpush1.msra.mxu0 %v4292_v57  ;;  %4363 = vmatprep.mubr.f32.mxu0 %v6089_v0 }
 0x8aa   : > { %4385 = vmatprep.subr.mxu0 %v4379_v58 }
 0x8b0   : > { %5905 = vmatmul.mubr.msk.f32.vlgmr.msra.gmra.mrb[6].mxu0 %vm314_vm3, %v5904_v3 }
 0x8b1   : > { %4386 = vmatpush1.msra.mxu0 %v4378_v4  ;;  %4449 = vmatprep.mubr.f32.mxu0 %v6089_v0 }
 0x8b2   : > { %4471 = vmatprep.subr.mxu0 %v4465_v1 }
 0x8b8   : > { %5907 = vmatmul.mubr.msk.f32.vlgmr.msra.gmra.mrb[6].mxu0 %vm314_vm3, %v5906_v18 }
 0x8b9   : > { %4472 = vmatpush1.msra.mxu0 %v4464_v19  ;;  %4535 = vmatprep.mubr.f32.mxu0 %v6089_v0 }
 0x8ba   : > { %4557 = vmatprep.subr.mxu0 %v4551_v20 }
 0x8c0   : > { %5909 = vmatmul.mubr.msk.f32.vlgmr.msra.gmra.mrb[6].mxu0 %vm314_vm3, %v5908_v22  ;;  %v5921_v22 = vld [vmem:[%s7133_s2 + $0x188] sm:$0xff] }
 0x8c1   : > { %4558 = vmatpush1.msra.mxu0 %v4550_v23  ;;  %4621 = vmatprep.mubr.f32.mxu0 %v6089_v0 }
 0x8c2   : > { %5423 = vmatprep.subr.mxu0 %v6079_v29 }
 0x8c8   : > { %5911 = vmatmul.mubr.msk.f32.vlgmr.msra.gmra.mrb[6].mxu0 %vm314_vm3, %v5910_v30 }
 0x8c9   : > { %5424 = vmatpush1.msra.mxu0 %v6080_v31  ;;  %5487 = vmatprep.mubr.f32.mxu0 %v6089_v0 }
 0x8ca   : > { %5506 = vmatprep.subr.mxu0 %v6511_v24  ;;  %v4635_v24 = vpop.permute.xlu1 %4634 }
 0x8cc   : > { %5934 = vmatmul.mubr.msk.f32.vlgmr.msra.gmra.mrb[8].mxu0 %vm314_vm3, %v5933_v32 }
 0x8cd   : > { %5507 = vmatpush1.msra.mxu0 %v6513_v26  ;;  %5570 = vmatprep.mubr.f32.mxu0 %v6089_v0 }
 0x8ce   : > { %5584 = vmatprep.subr.mxu0 %v3624_v47  ;;  %v5932_v47 = vld [vmem:[%s7136_s5 + $0x10] sm:$0xff] }
 0x8d4   : > { %5936 = vmatmul.mubr.msk.f32.vlgmr.msra.gmra.mrb[8].mxu0 %vm314_vm3, %v5935_v9 }
 0x8d5   : > { %5585 = vmatpush1.msra.mxu0 %v3623_v48  ;;  %5648 = vmatprep.mubr.f32.mxu0 %v6089_v0 }
 0x8dc   : > { %5938 = vmatmul.mubr.msk.f32.vlgmr.msra.gmra.mrb[8].mxu0 %vm314_vm3, %v5937_v7 }
 0x8dd   : > { %5726 = vmatprep.mubr.f32.mxu0 %v6089_v0 }
 0x99b   : > { %v4623_v34 = vpop.f32.mrb[6].mxu0 }
 0x99c   : > { %v4637_v37 = vadd.f32 %v4635_v24, %v4623_v34  ;;  %v4625_v26 = vpop.f32.mrb[7].mxu0 }
 0x99d   : > { %v4638_v38 = vadd.f32 %v4635_v24, %v4625_v26 }
 0x99e   : > { %v6976_v39 = vmax.f32 %v4637_v37, 0.0 }
 0x99f   : > { %v6978_v46 = vmax.f32 %v4638_v38, 0.0 }
 0x9a0   : > { %4651 = vrot.lane.b32.xlu0 %v6976_v39, %s6096_s9 }
 0x9a1   : > { %4653 = vrot.lane.b32.xlu1 %v6978_v46, %s6096_s9 }
 0x9a4   : > { %4641 = vrot.lane.b32.xlu0 %v6976_v39, %s6090_s27 }
 0x9a5   : > { %4643 = vrot.lane.b32.xlu1 %v6978_v46, %s6090_s27 }
 0x9a8   : > { %4809 = vrot.lane.b32.xlu0 %v6976_v39, %s6091_s28 }
 0x9a9   : > { %4811 = vrot.lane.b32.xlu1 %v6978_v46, %s6091_s28 }
 0x9ac   : > { %4895 = vrot.lane.b32.xlu0 %v6976_v39, %s6092_s29 }
 0x9ad   : > { %4897 = vrot.lane.b32.xlu1 %v6978_v46, %s6092_s29 }
 0x9b0   : > { %5059 = vrot.lane.b32.xlu0 %v6976_v39, %s6093_s30 }
 0x9b1   : > { %5061 = vrot.lane.b32.xlu1 %v6978_v46, %s6093_s30 }
 0x9b4   : > { %5145 = vrot.lane.b32.xlu0 %v6976_v39, %s6094_s7 }
 0x9b5   : > { %5147 = vrot.lane.b32.xlu1 %v6978_v46, %s6094_s7 }
 0x9b8   : > { %5231 = vrot.lane.b32.xlu0 %v6976_v39, %s6095_s8 }
 0x9b9   : > { %5233 = vrot.lane.b32.xlu1 %v6978_v46, %s6095_s8 }
 0x9bc   : > { %5317 = vrot.lane.b32.xlu0 %v6976_v39, %s6097_s10 }
 0x9bd   : > { %5319 = vrot.lane.b32.xlu1 %v6978_v46, %s6097_s10  ;;  %s251_s10 = scalar_lea.vmem %s7137_s6, %s5943_s23 }
 0x9c0   : > { %5407 = vperm.xlu0 %6077, %v5931_v44  }
 0x9c1   : > { %5496 = vperm.xlu1 %6078, %v5932_v47  }
 0xa12   : > { %v4652_v48 = vpop.permute.xlu0 %4651 }
 0xa13   : > { %v4654_v40 = vpop.permute.xlu1 %4653 }
 0xa14   : > { %v4655_v41 = vsel %vm296_vm5, %v4652_v48, %v4654_v40  ;;  %v4656_v42 = vsel %vm296_vm5, %v4654_v40, %v4652_v48 }
 0xa15   : > { %v4657_v43 = vmul.f32 %v4656_v42, %v6277_v50  ;;  %v4658_v51 = vmul.f32 %v4655_v41, %v6274_v49 }
 0xa16   : > { %v4642_v36 = vpop.permute.xlu0 %4641 }
 0xa17   : > { %4664 = vmatprep.subr.mxu1 %v4658_v51  ;;  %v4644_v52 = vpop.permute.xlu1 %4643 }
 0xa18   : > { %v4645_v53 = vsel %vm275_vm1, %v4642_v36, %v4644_v52  ;;  %v4646_v54 = vsel %vm275_vm1, %v4644_v52, %v4642_v36  ;;  %4665 = vmatpush1.msra.mxu1 %v4657_v43  ;;  %v5939_v36 = vld [vmem:[%s7135_s4 + $0x40] sm:$0xff] }
 0xa19   : > { %v4647_v57 = vmul.f32 %v4646_v54, %v6213_v15  ;;  %v4648_v50 = vmul.f32 %v4645_v53, %v6210_v14  ;;  %5915 = vmatmul.mubr.msk.f32.vlgmr.msra.gmra.mrb[8].mxu1 %vm314_vm3, %v5914_v8  ;;  %v5913_v14 = vld [vmem:[%s7133_s2 + $0x168] sm:$0xff] }
 0xa1a   : > { %v4810_v49 = vpop.permute.xlu0 %4809  ;;  %4802 = vmatprep.mubr.f32.mxu1 %v6089_v0 }
 0xa1b   : > { %4738 = vmatprep.subr.mxu1 %v4648_v50  ;;  %v4812_v58 = vpop.permute.xlu1 %4811 }
 0xa1c   : > { %v4813_v2 = vsel %vm467_vm0, %v4810_v49, %v4812_v58  ;;  %4739 = vmatpush1.msra.mxu1 %v4647_v57  ;;  %v4814_v59 = vsel %vm467_vm0, %v4812_v58, %v4810_v49 }
 0xa1d   : > { %v4816_v61 = vmul.f32 %v4813_v2, %v6216_v16  ;;  %v4815_v3 = vmul.f32 %v4814_v59, %v6219_v17 }
 0xa1e   : > { %v4896_v62 = vpop.permute.xlu0 %4895 }
 0xa1f   : > { %4822 = vmatprep.subr.mxu1 %v4816_v61  ;;  %v4898_v15 = vpop.permute.xlu1 %4897 }
 0xa20   : > { %v4899_v4 = vsel %vm565_vm2, %v4896_v62, %v4898_v15  ;;  %v4900_v16 = vsel %vm565_vm2, %v4898_v15, %v4896_v62 }
 0xa21   : > { %v4902_v1 = vmul.f32 %v4899_v4, %v6237_v28  ;;  %5916 = vmatmul.mubr.msk.f32.vlgmr.msra.gmra.mrb[8].mxu1 %vm314_vm3, %v5913_v14  ;;  %v4901_v17 = vmul.f32 %v4900_v16, %v6249_v35 }
 0xa22   : > { %4823 = vmatpush1.msra.mxu1 %v4815_v3  ;;  %4886 = vmatprep.mubr.f32.mxu1 %v6089_v0  ;;  %v5060_v28 = vpop.permute.xlu0 %5059 }
 0xa23   : > { %4908 = vmatprep.subr.mxu1 %v4902_v1  ;;  %v5062_v6 = vpop.permute.xlu1 %5061 }
 0xa24   : > { %v5064_v10 = vsel %vm741_vm4, %v5062_v6, %v5060_v28  ;;  %v5063_v20 = vsel %vm741_vm4, %v5060_v28, %v5062_v6 }
 0xa25   : > { %v5066_v18 = vmul.f32 %v5064_v10, %v6268_v45  ;;  %v5065_v45 = vmul.f32 %v5063_v20, %v6297_v60  ;;  %v5923_v60 = vld [vmem:[%s7133_s2 + $0x190] sm:$0xff] }
 0xa26   : > { %v5146_v35 = vpop.permute.xlu0 %5145 }
 0xa27   : > { %v5148_v19 = vpop.permute.xlu1 %5147 }
 0xa28   : > { %v5150_v21 = vsel %vm839_vm6, %v5148_v19, %v5146_v35  ;;  %v5149_v31 = vsel %vm839_vm6, %v5146_v35, %v5148_v19 }
 0xa29   : > { %5918 = vmatmul.mubr.msk.f32.vlgmr.msra.gmra.mrb[8].mxu1 %vm314_vm3, %v5917_v5  ;;  %v5152_v23 = vmul.f32 %v5150_v21, %v6305_v63  ;;  %v5151_v63 = vmul.f32 %v5149_v31, %v6323_v11  ;;  %v5925_v11 = vld [vmem:[%s7133_s2 + $0x198] sm:$0xff] }
 0xa2a   : > { %4909 = vmatpush1.msra.mxu1 %v4901_v17  ;;  %4972 = vmatprep.mubr.f32.mxu1 %v6089_v0  ;;  %v5232_v29 = vpop.permute.xlu0 %5231 }
 0xa2b   : > { %4986 = vmatprep.subr.mxu1 %v6978_v46  ;;  %v5234_v30 = vpop.permute.xlu1 %5233  ;;  %v5927_v46 = vld [vmem:[%s7133_s2 + $0x1a0] sm:$0xff] }
 0xa2c   : > { %v5236_v32 = vsel %vm937_vm7, %v5234_v30, %v5232_v29  ;;  %v5235_v37 = vsel %vm937_vm7, %v5232_v29, %v5234_v30 }
 0xa2d   : > { %v5238_v9 = vmul.f32 %v5236_v32, %v6328_v13  ;;  %v5237_v13 = vmul.f32 %v5235_v37, %v6344_v25  ;;  %v5929_v25 = vld [vmem:[%s7133_s2 + $0x1a8] sm:$0xff] }
 0xa2e   : > { %v5318_v24 = vpop.permute.xlu0 %5317 }
 0xa2f   : > { %v5320_v34 = vpop.permute.xlu1 %5319 }
 0xa30   : > { %v5322_v26 = vsel %vm1035_vm8, %v5320_v34, %v5318_v24 }
 0xa31   : > { %5920 = vmatmul.mubr.msk.f32.vlgmr.msra.gmra.mrb[8].mxu1 %vm314_vm3, %v5919_v12  ;;  %v5324_v38 = vmul.f32 %v5322_v26, %v6349_v27 }
 0xa32   : > { %4987 = vmatpush1.msra.mxu1 %v6976_v39  ;;  %5050 = vmatprep.mubr.f32.mxu1 %v6089_v0  ;;  %v5321_v39 = vsel %vm1035_vm8, %v5318_v24, %v5320_v34 }
 0xa33   : > { %5072 = vmatprep.subr.mxu1 %v5066_v18  ;;  %v5323_v44 = vmul.f32 %v5321_v39, %v6361_v33 }
 0xa39   : > { %5922 = vmatmul.mubr.msk.f32.vlgmr.msra.gmra.mrb[8].mxu1 %vm314_vm3, %v5921_v22 }
 0xa3a   : > { %5073 = vmatpush1.msra.mxu1 %v5065_v45  ;;  %5136 = vmatprep.mubr.f32.mxu1 %v6089_v0 }
 0xa3b   : > { %5158 = vmatprep.subr.mxu1 %v5152_v23 }
 0xa3f   : > { %v5408_v27 = vpop.permute.xlu0 %5407 }
 0xa41   : > { %5924 = vmatmul.mubr.msk.f32.vlgmr.msra.gmra.mrb[8].mxu1 %vm314_vm3, %v5923_v60 }
 0xa42   : > { %5159 = vmatpush1.msra.mxu1 %v5151_v63  ;;  %5222 = vmatprep.mubr.f32.mxu1 %v6089_v0 }
 0xa43   : > { %5244 = vmatprep.subr.mxu1 %v5238_v9 }
 0xa49   : > { %5926 = vmatmul.mubr.msk.f32.vlgmr.msra.gmra.mrb[8].mxu1 %vm314_vm3, %v5925_v11 }
 0xa4a   : > { %5245 = vmatpush1.msra.mxu1 %v5237_v13  ;;  %5308 = vmatprep.mubr.f32.mxu1 %v6089_v0 }
 0xa4b   : > { %5330 = vmatprep.subr.mxu1 %v5324_v38 }
 0xa51   : > { %5928 = vmatmul.mubr.msk.f32.vlgmr.msra.gmra.mrb[8].mxu1 %vm314_vm3, %v5927_v46 }
 0xa52   : > { %5331 = vmatpush1.msra.mxu1 %v5323_v44  ;;  %5394 = vmatprep.mubr.f32.mxu1 %v6089_v0  ;;  %v5497_v0 = vpop.permute.xlu1 %5496 }
 0xa59   : > { %5930 = vmatmul.mubr.msk.f32.vlgmr.msra.gmra.mrb[8].mxu1 %vm314_vm3, %v5929_v25 }
 0xb2c   : > { %v5396_v33 = vpop.f32.mrb[8].mxu1 }
 0xb2d   : > { %v5410_v47 = vadd.f32 %v5408_v27, %v5396_v33  ;;  %v5398_v48 = vpop.f32.mrb[9].mxu1 }
 0xb2e   : > { %v5411_v40 = vadd.f32 %v5408_v27, %v5398_v48 }
 0xb2f   : > { %v5412_v41 = vadd.f32 %v5410_v47, %v6824_v55 }
 0xb30   : > { %v5413_v42 = vadd.f32 %v5411_v40, %v6826_v56 }
 0xb31   : > { %v5414_v51 = vmax.f32 %v5412_v41, 0.0 }
 0xb32   : > { %v5415_v43 = vmax.f32 %v5413_v42, 0.0 }
 0xb34   : > { %5662 = vmatprep.subr.mxu0 %v5415_v43 }
 0xb35   : > { %5663 = vmatpush1.msra.mxu0 %v5414_v51 }
 0xb36   : > { %5940 = vmatmul.mubr.msk.f32.vlgmr.msra.gmra.mrb[8].mxu0 %vm314_vm3, %v5939_v36 }
 0xc09   : > { %v5728_v8 = vpop.f32.mrb[8].mxu0 }
 0xc0a   : > { %v5951_v52 = vadd.f32 %v5728_v8, %v5497_v0  ;;  %v5730_v53 = vpop.f32.mrb[9].mxu0 }
 0xc0b   : > { %v5952_v55 = vadd.f32 %v5730_v53, %v5497_v0 }
 0xc0c   : > { %v5735_v56 = vmax.f32 %v5951_v52, 0.0 }
 0xc0d   : > { %v5736_v54 = vmax.f32 %v5952_v55, 0.0 }
 0xc0e   : > { %5737 = vst [vmem:[%s251_s10] sm:$0xff] %v5735_v56 }
 0xc0f   : > { %5738 = vst [vmem:[%s251_s10 + $0x8] sm:$0xff] %v5736_v54 }
 0xc10 PF: > { %s16_s21 = sadd.s32 1, %s6087_s21  }
 0xc11   : > { %p13_p4 = scmp.ge.s32.totalorder %s16_s21, 4  }
 0xc13   :  { %15 = sbr.rel (!%p13_p4) target bundleno = 1 (0x1), region = 149 }

</bundles_post_ra>
